<compile_context>
chip_gen: v5e
topology: v5e:2x2
jax: 0.10.0
libtpu: 0.0.40
codegen_flags: <defaults>
</compile_context>

<pallas_src>
import functools
import numpy as np
import jax
import jax.numpy as jnp
from jax.experimental import pallas as pl
from jax.experimental.pallas import tpu as pltpu


# --------------------------------------------------------------------------
# trace-time weight / interp-matrix repacking (done once per weight set)
# --------------------------------------------------------------------------
def _banded_conv_matrix(wt, W):
    """(3,3,Cin,Cout) HWIO conv weights -> (3*W*Cin, W*Cout) banded matrix.

    With P[h, dy*W*Cin + wi*Cin + ci] = x_padH[h+dy, wi*Cin+ci] (input padded by
    one zero row top & bottom only), the conv is  out = P @ M + bias.  Taps that
    fall outside [0, W) along W map to structural zeros in M (== zero padding).
    """
    Cin, Cout = int(wt.shape[2]), int(wt.shape[3])
    wi = np.arange(W)[:, None]                     # w_in
    wo = np.arange(W)[None, :]                     # w_out
    dx = wi - wo + 1                               # (W, W) tap index
    valid = ((dx >= 0) & (dx <= 2)).astype(np.float32)
    dx_c = np.clip(dx, 0, 2)
    m = wt[:, dx_c, :, :]                          # (3, W, W, Cin, Cout) gather
    m = m * jnp.asarray(valid)[None, :, :, None, None]
    m = jnp.transpose(m, (0, 1, 3, 2, 4))          # (3, W, Cin, W, Cout)
    return m.reshape(3 * W * Cin, W * Cout)


def _interp_matrix(in_size, scale):
    """1-D bilinear interp matrix matching F.interpolate(align_corners=False)."""
    out_size = in_size * scale
    m = np.zeros((out_size, in_size), np.float32)
    for p in range(out_size):
        src = (p + 0.5) * (in_size / out_size) - 0.5
        src = max(src, 0.0)                        # torch clamps negatives
        i0 = int(np.floor(src))
        frac = src - i0
        m[p, min(max(i0, 0), in_size - 1)] += 1.0 - frac
        m[p, min(max(i0 + 1, 0), in_size - 1)] += frac
    return m


# --------------------------------------------------------------------------
# fused kernel: one grid step = one batch element, everything in VMEM
# --------------------------------------------------------------------------
def _refine_kernel(f_ref, pm_ref, wfs_ref, wres_ref, b_ref, rmat_ref, cmat_ref,
                   o_ref, *, H, W, Cin, Cp):
    f32 = jnp.float32

    def conv3x3(x2, wmat, brow, cin):
        # x2: (H, W*cin) lane-dense fp32 (already post-ReLU where required).
        zrow = jnp.zeros((1, W * cin), f32)
        xp = jnp.concatenate([zrow, x2, zrow], axis=0)            # (H+2, W*cin)
        patches = jnp.concatenate(
            [xp[0:H], xp[1:H + 1], xp[2:H + 2]], axis=1)          # (H, 3*W*cin)
        return jnp.dot(patches, wmat, preferred_element_type=f32) + brow

    def relu(v):
        return jnp.maximum(v, 0.0)

    x = f_ref[0].astype(f32)                                      # (H, W*Cin)
    b = b_ref[...].astype(f32)                                    # (5, W*Cp)

    # s = ResFS(convFS(f))
    s = conv3x3(x, wfs_ref[...], b[0:1], Cin)
    r = conv3x3(relu(s), wres_ref[0], b[1:2], Cp)
    r = conv3x3(relu(r), wres_ref[1], b[2:3], Cp)
    s = s + r

    # bilinear x2 upsample of pm (NHWC lane-dense): R @ X @ Cmat
    p = pm_ref[0].astype(f32)                                     # (h, w*Cp)
    up = jnp.dot(rmat_ref[...], p, preferred_element_type=f32)    # (H, w*Cp)
    up = jnp.dot(up, cmat_ref[...], preferred_element_type=f32)   # (H, W*Cp)
    m = s + up

    # m = ResMM(m)
    r = conv3x3(relu(m), wres_ref[2], b[3:4], Cp)
    r = conv3x3(relu(r), wres_ref[3], b[4:5], Cp)
    m = m + r

    o_ref[0] = m.astype(o_ref.dtype)


# --------------------------------------------------------------------------
# wrapper: Refine(f, pm) forward
# --------------------------------------------------------------------------
def refine_forward(params, f_nhwc, pm_nhwc, scale_factor=2):
    N, H, W, Cin = f_nhwc.shape
    Np, h, w, Cp = pm_nhwc.shape
    assert Np == N and H == h * scale_factor and W == w * scale_factor

    # lane-dense views (free reshapes: contiguous collapse of the last 2 dims)
    f2 = f_nhwc.reshape(N, H, W * Cin)
    pm2 = pm_nhwc.reshape(N, h, w * Cp)

    # weight repacking (trace time; hoisted / done once per weight set in practice)
    w_fs = _banded_conv_matrix(params["convFS_w"], W)             # (3*W*Cin, W*Cp)
    w_res = jnp.stack([
        _banded_conv_matrix(params["ResFS_w1"], W),
        _banded_conv_matrix(params["ResFS_w2"], W),
        _banded_conv_matrix(params["ResMM_w1"], W),
        _banded_conv_matrix(params["ResMM_w2"], W),
    ])                                                            # (4, 3*W*Cp, W*Cp)
    biases = jnp.stack([
        jnp.tile(params["convFS_b"], W),
        jnp.tile(params["ResFS_b1"], W),
        jnp.tile(params["ResFS_b2"], W),
        jnp.tile(params["ResMM_b1"], W),
        jnp.tile(params["ResMM_b2"], W),
    ])                                                            # (5, W*Cp)

    rmat = jnp.asarray(_interp_matrix(h, scale_factor))           # (H, h)
    cw = _interp_matrix(w, scale_factor)                          # (W, w)
    cmat = jnp.asarray(
        np.einsum("oi,cd->icod", cw, np.eye(Cp, dtype=np.float32))
        .reshape(w * Cp, W * Cp))                                 # (w*Cp, W*Cp)

    kernel = functools.partial(_refine_kernel, H=H, W=W, Cin=Cin, Cp=Cp)

    def conv_flops(cin):
        return 2 * H * W * 9 * cin * Cp

    flops = N * (conv_flops(Cin) + 4 * conv_flops(Cp)
                 + 2 * H * h * w * Cp + 2 * H * w * Cp * W * Cp)
    bytes_accessed = 4 * int(f2.size + pm2.size + w_fs.size + w_res.size
                             + biases.size + rmat.size + cmat.size
                             + N * H * W * Cp)

    out2 = pl.pallas_call(
        kernel,
        out_shape=jax.ShapeDtypeStruct((N, H, W * Cp), f_nhwc.dtype),
        grid=(N,),
        in_specs=[
            pl.BlockSpec((1, H, W * Cin), lambda n: (n, 0, 0)),    # f (lane-dense)
            pl.BlockSpec((1, h, w * Cp), lambda n: (n, 0, 0)),     # pm (lane-dense)
            pl.BlockSpec(w_fs.shape, lambda n: (0, 0)),            # convFS weights
            pl.BlockSpec(w_res.shape, lambda n: (0, 0, 0)),        # 4 res conv weights
            pl.BlockSpec(biases.shape, lambda n: (0, 0)),          # 5 bias rows
            pl.BlockSpec(rmat.shape, lambda n: (0, 0)),            # row interp
            pl.BlockSpec(cmat.shape, lambda n: (0, 0)),            # col interp
        ],
        out_specs=pl.BlockSpec((1, H, W * Cp), lambda n: (n, 0, 0)),
        compiler_params=pltpu.CompilerParams(dimension_semantics=("parallel",)),
        cost_estimate=pl.CostEstimate(flops=flops, transcendentals=0,
                                      bytes_accessed=bytes_accessed),
    )(f2, pm2, w_fs, w_res, biases, rmat, cmat)

    return out2.reshape(N, H, W, Cp)


# --------------------------------------------------------------------------
# pure-JAX reference (for a numerical self-check only)
# --------------------------------------------------------------------------
def _conv3x3_ref(x, w, b):
    y = jax.lax.conv_general_dilated(
        x, w, window_strides=(1, 1), padding=((1, 1), (1, 1)),
        dimension_numbers=("NHWC", "HWIO", "NHWC"),
        precision=jax.lax.Precision.HIGHEST)
    return y + b


def refine_reference(params, f, pm, scale_factor=2):
    _, h, w, _ = pm.shape
    s = _conv3x3_ref(f, params["convFS_w"], params["convFS_b"])
    r = _conv3x3_ref(jax.nn.relu(s), params["ResFS_w1"], params["ResFS_b1"])
    r = _conv3x3_ref(jax.nn.relu(r), params["ResFS_w2"], params["ResFS_b2"])
    s = s + r
    R = jnp.asarray(_interp_matrix(h, scale_factor))
    Cw = jnp.asarray(_interp_matrix(w, scale_factor))
    up = jnp.einsum("Hh,nhwc->nHwc", R, pm, precision=jax.lax.Precision.HIGHEST)
    up = jnp.einsum("Ww,nHwc->nHWc", Cw, up, precision=jax.lax.Precision.HIGHEST)
    m = s + up
    r = _conv3x3_ref(jax.nn.relu(m), params["ResMM_w1"], params["ResMM_b1"])
    r = _conv3x3_ref(jax.nn.relu(r), params["ResMM_w2"], params["ResMM_b2"])
    return m + r


if __name__ == "__main__":
    inplanes, planes, scale_factor = 8, 8, 2
    N, H, W = 2, 16, 16

    key = jax.random.PRNGKey(0)
    ks = jax.random.split(key, 12)

    def w_init(k, cin, cout):
        return 0.1 * jax.random.normal(k, (3, 3, cin, cout), jnp.float32)

    def b_init(k, cout):
        return 0.05 * jax.random.normal(k, (cout,), jnp.float32)

    params = {
        "convFS_w": w_init(ks[0], inplanes, planes), "convFS_b": b_init(ks[1], planes),
        "ResFS_w1": w_init(ks[2], planes, planes),   "ResFS_b1": b_init(ks[3], planes),
        "ResFS_w2": w_init(ks[4], planes, planes),   "ResFS_b2": b_init(ks[5], planes),
        "ResMM_w1": w_init(ks[6], planes, planes),   "ResMM_b1": b_init(ks[7], planes),
        "ResMM_w2": w_init(ks[8], planes, planes),   "ResMM_b2": b_init(ks[9], planes),
    }

    # PyTorch Refine takes f: (N, inplanes, H, W), pm: (N, planes, H/2, W/2) in
    # NCHW; we carry the same tensors in NHWC (channel-last == TPU lanes).
    f = jax.random.normal(ks[10], (N, H, W, inplanes), jnp.float32)
    pm = jax.random.normal(
        ks[11], (N, H // scale_factor, W // scale_factor, planes), jnp.float32)

    out = refine_forward(params, f, pm, scale_factor)
    jax.block_until_ready(out)
    assert out.shape == (N, H, W, planes)

    ref = refine_reference(params, f, pm, scale_factor)
    err = float(jnp.max(jnp.abs(out - ref)))
    assert err < 5e-3, f"numerical mismatch vs reference: max abs err {err}"
    print("KERNEL_OK")
</pallas_src>

<mosaic_0001>
module attributes {stable_mosaic.version = 11 : i64} {
  func.func @_refine_kernel(%arg0: i32, %arg1: memref<1x16x128xf32, #tpu.memory_space<vmem>>, %arg2: memref<1x8x64xf32, #tpu.memory_space<vmem>>, %arg3: memref<384x128xf32, #tpu.memory_space<vmem>>, %arg4: memref<4x384x128xf32, #tpu.memory_space<vmem>>, %arg5: memref<5x128xf32, #tpu.memory_space<vmem>>, %arg6: memref<16x8xf32, #tpu.memory_space<vmem>>, %arg7: memref<64x128xf32, #tpu.memory_space<vmem>>, %arg8: memref<1x16x128xf32, #tpu.memory_space<vmem>>) attributes {dimension_semantics = [#tpu.dimension_semantics<parallel>], iteration_bounds = array<i64: 2>, scalar_prefetch = 0 : i64, scratch_operands = 0 : i64, tpu.core_type = #tpu.core_type<tc>, window_params = [{transform_indices = @transform_0, window_bounds = array<i64: 1, 16, 128>}, {transform_indices = @transform_1, window_bounds = array<i64: 1, 8, 64>}, {pipeline_mode = #tpu.pipeline_mode<synchronous>, transform_indices = @transform_2, window_bounds = array<i64: 384, 128>}, {pipeline_mode = #tpu.pipeline_mode<synchronous>, transform_indices = @transform_3, window_bounds = array<i64: 4, 384, 128>}, {pipeline_mode = #tpu.pipeline_mode<synchronous>, transform_indices = @transform_4, window_bounds = array<i64: 5, 128>}, {pipeline_mode = #tpu.pipeline_mode<synchronous>, transform_indices = @transform_5, window_bounds = array<i64: 16, 8>}, {pipeline_mode = #tpu.pipeline_mode<synchronous>, transform_indices = @transform_6, window_bounds = array<i64: 64, 128>}, {transform_indices = @transform_7, window_bounds = array<i64: 1, 16, 128>}]} {
    %c0 = arith.constant 0 : index
    %c0_0 = arith.constant 0 : index
    %c0_1 = arith.constant 0 : index
    %0 = vector.load %arg1[%c0, %c0_0, %c0_1] : memref<1x16x128xf32, #tpu.memory_space<vmem>>, vector<1x16x128xf32>
    %1 = vector.shape_cast %0 : vector<1x16x128xf32> to vector<16x128xf32>
    %c0_2 = arith.constant 0 : index
    %c0_3 = arith.constant 0 : index
    %2 = vector.load %arg5[%c0_2, %c0_3] : memref<5x128xf32, #tpu.memory_space<vmem>>, vector<5x128xf32>
    %c0_4 = arith.constant 0 : index
    %c0_5 = arith.constant 0 : index
    %3 = vector.load %arg3[%c0_4, %c0_5] : memref<384x128xf32, #tpu.memory_space<vmem>>, vector<384x128xf32>
    %4 = vector.extract_strided_slice %2 {offsets = [0, 0], sizes = [1, 128], strides = [1, 1]} : vector<5x128xf32> to vector<1x128xf32>
    %cst = arith.constant 0.000000e+00 : f32
    %5 = vector.broadcast %cst : f32 to vector<1x128xf32>
    %6 = tpu.concatenate %5, %1, %5 in 0 : vector<1x128xf32>, vector<16x128xf32>, vector<1x128xf32> -> vector<18x128xf32>
    %7 = vector.extract_strided_slice %6 {offsets = [0, 0], sizes = [16, 128], strides = [1, 1]} : vector<18x128xf32> to vector<16x128xf32>
    %8 = vector.extract_strided_slice %6 {offsets = [1, 0], sizes = [16, 128], strides = [1, 1]} : vector<18x128xf32> to vector<16x128xf32>
    %9 = vector.extract_strided_slice %6 {offsets = [2, 0], sizes = [16, 128], strides = [1, 1]} : vector<18x128xf32> to vector<16x128xf32>
    %10 = tpu.concatenate %7, %8, %9 in 1 : vector<16x128xf32>, vector<16x128xf32>, vector<16x128xf32> -> vector<16x384xf32>
    %cst_6 = arith.constant dense<0.000000e+00> : vector<16x128xf32>
    %11 = tpu.matmul %10, %3, %cst_6 {dimension_numbers = #tpu.dot_dimension_numbers<[1], [0], [0], [1], [0, 0, 1, 1], [], []>} : vector<16x384xf32>, vector<384x128xf32>, vector<16x128xf32> -> vector<16x128xf32>
    %12 = vector.broadcast %4 : vector<1x128xf32> to vector<16x128xf32>
    %13 = arith.addf %11, %12 : vector<16x128xf32>
    %cst_7 = arith.constant 0.000000e+00 : f32
    %14 = vector.broadcast %cst_7 : f32 to vector<16x128xf32>
    %15 = arith.maximumf %13, %14 : vector<16x128xf32>
    %c0_8 = arith.constant 0 : index
    %c0_9 = arith.constant 0 : index
    %c0_10 = arith.constant 0 : index
    %16 = vector.load %arg4[%c0_8, %c0_9, %c0_10] : memref<4x384x128xf32, #tpu.memory_space<vmem>>, vector<1x384x128xf32>
    %17 = vector.shape_cast %16 : vector<1x384x128xf32> to vector<384x128xf32>
    %18 = vector.extract_strided_slice %2 {offsets = [1, 0], sizes = [1, 128], strides = [1, 1]} : vector<5x128xf32> to vector<1x128xf32>
    %cst_11 = arith.constant 0.000000e+00 : f32
    %19 = vector.broadcast %cst_11 : f32 to vector<1x128xf32>
    %20 = tpu.concatenate %19, %15, %19 in 0 : vector<1x128xf32>, vector<16x128xf32>, vector<1x128xf32> -> vector<18x128xf32>
    %21 = vector.extract_strided_slice %20 {offsets = [0, 0], sizes = [16, 128], strides = [1, 1]} : vector<18x128xf32> to vector<16x128xf32>
    %22 = vector.extract_strided_slice %20 {offsets = [1, 0], sizes = [16, 128], strides = [1, 1]} : vector<18x128xf32> to vector<16x128xf32>
    %23 = vector.extract_strided_slice %20 {offsets = [2, 0], sizes = [16, 128], strides = [1, 1]} : vector<18x128xf32> to vector<16x128xf32>
    %24 = tpu.concatenate %21, %22, %23 in 1 : vector<16x128xf32>, vector<16x128xf32>, vector<16x128xf32> -> vector<16x384xf32>
    %cst_12 = arith.constant dense<0.000000e+00> : vector<16x128xf32>
    %25 = tpu.matmul %24, %17, %cst_12 {dimension_numbers = #tpu.dot_dimension_numbers<[1], [0], [0], [1], [0, 0, 1, 1], [], []>} : vector<16x384xf32>, vector<384x128xf32>, vector<16x128xf32> -> vector<16x128xf32>
    %26 = vector.broadcast %18 : vector<1x128xf32> to vector<16x128xf32>
    %27 = arith.addf %25, %26 : vector<16x128xf32>
    %cst_13 = arith.constant 0.000000e+00 : f32
    %28 = vector.broadcast %cst_13 : f32 to vector<16x128xf32>
    %29 = arith.maximumf %27, %28 : vector<16x128xf32>
    %c1 = arith.constant 1 : index
    %c0_14 = arith.constant 0 : index
    %c0_15 = arith.constant 0 : index
    %30 = vector.load %arg4[%c1, %c0_14, %c0_15] : memref<4x384x128xf32, #tpu.memory_space<vmem>>, vector<1x384x128xf32>
    %31 = vector.shape_cast %30 : vector<1x384x128xf32> to vector<384x128xf32>
    %32 = vector.extract_strided_slice %2 {offsets = [2, 0], sizes = [1, 128], strides = [1, 1]} : vector<5x128xf32> to vector<1x128xf32>
    %cst_16 = arith.constant 0.000000e+00 : f32
    %33 = vector.broadcast %cst_16 : f32 to vector<1x128xf32>
    %34 = tpu.concatenate %33, %29, %33 in 0 : vector<1x128xf32>, vector<16x128xf32>, vector<1x128xf32> -> vector<18x128xf32>
    %35 = vector.extract_strided_slice %34 {offsets = [0, 0], sizes = [16, 128], strides = [1, 1]} : vector<18x128xf32> to vector<16x128xf32>
    %36 = vector.extract_strided_slice %34 {offsets = [1, 0], sizes = [16, 128], strides = [1, 1]} : vector<18x128xf32> to vector<16x128xf32>
    %37 = vector.extract_strided_slice %34 {offsets = [2, 0], sizes = [16, 128], strides = [1, 1]} : vector<18x128xf32> to vector<16x128xf32>
    %38 = tpu.concatenate %35, %36, %37 in 1 : vector<16x128xf32>, vector<16x128xf32>, vector<16x128xf32> -> vector<16x384xf32>
    %cst_17 = arith.constant dense<0.000000e+00> : vector<16x128xf32>
    %39 = tpu.matmul %38, %31, %cst_17 {dimension_numbers = #tpu.dot_dimension_numbers<[1], [0], [0], [1], [0, 0, 1, 1], [], []>} : vector<16x384xf32>, vector<384x128xf32>, vector<16x128xf32> -> vector<16x128xf32>
    %40 = vector.broadcast %32 : vector<1x128xf32> to vector<16x128xf32>
    %41 = arith.addf %39, %40 : vector<16x128xf32>
    %42 = arith.addf %13, %41 : vector<16x128xf32>
    %c0_18 = arith.constant 0 : index
    %c0_19 = arith.constant 0 : index
    %c0_20 = arith.constant 0 : index
    %43 = vector.load %arg2[%c0_18, %c0_19, %c0_20] : memref<1x8x64xf32, #tpu.memory_space<vmem>>, vector<1x8x64xf32>
    %44 = vector.shape_cast %43 : vector<1x8x64xf32> to vector<8x64xf32>
    %c0_21 = arith.constant 0 : index
    %c0_22 = arith.constant 0 : index
    %45 = vector.load %arg6[%c0_21, %c0_22] : memref<16x8xf32, #tpu.memory_space<vmem>>, vector<16x8xf32>
    %cst_23 = arith.constant dense<0.000000e+00> : vector<16x64xf32>
    %46 = tpu.matmul %45, %44, %cst_23 {dimension_numbers = #tpu.dot_dimension_numbers<[1], [0], [0], [1], [0, 0, 1, 1], [], []>} : vector<16x8xf32>, vector<8x64xf32>, vector<16x64xf32> -> vector<16x64xf32>
    %c0_24 = arith.constant 0 : index
    %c0_25 = arith.constant 0 : index
    %47 = vector.load %arg7[%c0_24, %c0_25] : memref<64x128xf32, #tpu.memory_space<vmem>>, vector<64x128xf32>
    %cst_26 = arith.constant dense<0.000000e+00> : vector<16x128xf32>
    %48 = tpu.matmul %46, %47, %cst_26 {dimension_numbers = #tpu.dot_dimension_numbers<[1], [0], [0], [1], [0, 0, 1, 1], [], []>} : vector<16x64xf32>, vector<64x128xf32>, vector<16x128xf32> -> vector<16x128xf32>
    %49 = arith.addf %42, %48 : vector<16x128xf32>
    %cst_27 = arith.constant 0.000000e+00 : f32
    %50 = vector.broadcast %cst_27 : f32 to vector<16x128xf32>
    %51 = arith.maximumf %49, %50 : vector<16x128xf32>
    %c2 = arith.constant 2 : index
    %c0_28 = arith.constant 0 : index
    %c0_29 = arith.constant 0 : index
    %52 = vector.load %arg4[%c2, %c0_28, %c0_29] : memref<4x384x128xf32, #tpu.memory_space<vmem>>, vector<1x384x128xf32>
    %53 = vector.shape_cast %52 : vector<1x384x128xf32> to vector<384x128xf32>
    %54 = vector.extract_strided_slice %2 {offsets = [3, 0], sizes = [1, 128], strides = [1, 1]} : vector<5x128xf32> to vector<1x128xf32>
    %cst_30 = arith.constant 0.000000e+00 : f32
    %55 = vector.broadcast %cst_30 : f32 to vector<1x128xf32>
    %56 = tpu.concatenate %55, %51, %55 in 0 : vector<1x128xf32>, vector<16x128xf32>, vector<1x128xf32> -> vector<18x128xf32>
    %57 = vector.extract_strided_slice %56 {offsets = [0, 0], sizes = [16, 128], strides = [1, 1]} : vector<18x128xf32> to vector<16x128xf32>
    %58 = vector.extract_strided_slice %56 {offsets = [1, 0], sizes = [16, 128], strides = [1, 1]} : vector<18x128xf32> to vector<16x128xf32>
    %59 = vector.extract_strided_slice %56 {offsets = [2, 0], sizes = [16, 128], strides = [1, 1]} : vector<18x128xf32> to vector<16x128xf32>
    %60 = tpu.concatenate %57, %58, %59 in 1 : vector<16x128xf32>, vector<16x128xf32>, vector<16x128xf32> -> vector<16x384xf32>
    %cst_31 = arith.constant dense<0.000000e+00> : vector<16x128xf32>
    %61 = tpu.matmul %60, %53, %cst_31 {dimension_numbers = #tpu.dot_dimension_numbers<[1], [0], [0], [1], [0, 0, 1, 1], [], []>} : vector<16x384xf32>, vector<384x128xf32>, vector<16x128xf32> -> vector<16x128xf32>
    %62 = vector.broadcast %54 : vector<1x128xf32> to vector<16x128xf32>
    %63 = arith.addf %61, %62 : vector<16x128xf32>
    %cst_32 = arith.constant 0.000000e+00 : f32
    %64 = vector.broadcast %cst_32 : f32 to vector<16x128xf32>
    %65 = arith.maximumf %63, %64 : vector<16x128xf32>
    %c3 = arith.constant 3 : index
    %c0_33 = arith.constant 0 : index
    %c0_34 = arith.constant 0 : index
    %66 = vector.load %arg4[%c3, %c0_33, %c0_34] : memref<4x384x128xf32, #tpu.memory_space<vmem>>, vector<1x384x128xf32>
    %67 = vector.shape_cast %66 : vector<1x384x128xf32> to vector<384x128xf32>
    %68 = vector.extract_strided_slice %2 {offsets = [4, 0], sizes = [1, 128], strides = [1, 1]} : vector<5x128xf32> to vector<1x128xf32>
    %cst_35 = arith.constant 0.000000e+00 : f32
    %69 = vector.broadcast %cst_35 : f32 to vector<1x128xf32>
    %70 = tpu.concatenate %69, %65, %69 in 0 : vector<1x128xf32>, vector<16x128xf32>, vector<1x128xf32> -> vector<18x128xf32>
    %71 = vector.extract_strided_slice %70 {offsets = [0, 0], sizes = [16, 128], strides = [1, 1]} : vector<18x128xf32> to vector<16x128xf32>
    %72 = vector.extract_strided_slice %70 {offsets = [1, 0], sizes = [16, 128], strides = [1, 1]} : vector<18x128xf32> to vector<16x128xf32>
    %73 = vector.extract_strided_slice %70 {offsets = [2, 0], sizes = [16, 128], strides = [1, 1]} : vector<18x128xf32> to vector<16x128xf32>
    %74 = tpu.concatenate %71, %72, %73 in 1 : vector<16x128xf32>, vector<16x128xf32>, vector<16x128xf32> -> vector<16x384xf32>
    %cst_36 = arith.constant dense<0.000000e+00> : vector<16x128xf32>
    %75 = tpu.matmul %74, %67, %cst_36 {dimension_numbers = #tpu.dot_dimension_numbers<[1], [0], [0], [1], [0, 0, 1, 1], [], []>} : vector<16x384xf32>, vector<384x128xf32>, vector<16x128xf32> -> vector<16x128xf32>
    %76 = vector.broadcast %68 : vector<1x128xf32> to vector<16x128xf32>
    %77 = arith.addf %75, %76 : vector<16x128xf32>
    %78 = arith.addf %49, %77 : vector<16x128xf32>
    %c0_37 = arith.constant 0 : index
    %c0_38 = arith.constant 0 : index
    %c0_39 = arith.constant 0 : index
    %79 = vector.load %arg8[%c0_37, %c0_38, %c0_39] : memref<1x16x128xf32, #tpu.memory_space<vmem>>, vector<1x16x128xf32>
    %80 = vector.shape_cast %79 : vector<1x16x128xf32> to vector<16x128xf32>
    %81 = vector.shape_cast %78 : vector<16x128xf32> to vector<1x16x128xf32>
    tpu.vector_store %arg8[%c0_37, %c0_38, %c0_39], %81 {strides = array<i32>} : memref<1x16x128xf32, #tpu.memory_space<vmem>>, vector<1x16x128xf32>,
    return
  }
  func.func @transform_0(%arg0: i32) -> (i32, i32, i32) {
    %c0_i32 = arith.constant 0 : i32
    %c0_i32_0 = arith.constant 0 : i32
    %c0_i32_1 = arith.constant 0 : i32
    return %arg0, %c0_i32, %c0_i32_0 : i32, i32, i32
  }
  func.func @transform_1(%arg0: i32) -> (i32, i32, i32) {
    %c0_i32 = arith.constant 0 : i32
    %c0_i32_0 = arith.constant 0 : i32
    %c0_i32_1 = arith.constant 0 : i32
    return %arg0, %c0_i32, %c0_i32_0 : i32, i32, i32
  }
  func.func @transform_2(%arg0: i32) -> (i32, i32) {
    %c0_i32 = arith.constant 0 : i32
    %c0_i32_0 = arith.constant 0 : i32
    %c0_i32_1 = arith.constant 0 : i32
    return %c0_i32, %c0_i32_0 : i32, i32
  }
  func.func @transform_3(%arg0: i32) -> (i32, i32, i32) {
    %c0_i32 = arith.constant 0 : i32
    %c0_i32_0 = arith.constant 0 : i32
    %c0_i32_1 = arith.constant 0 : i32
    %c0_i32_2 = arith.constant 0 : i32
    return %c0_i32, %c0_i32_0, %c0_i32_1 : i32, i32, i32
  }
  func.func @transform_4(%arg0: i32) -> (i32, i32) {
    %c0_i32 = arith.constant 0 : i32
    %c0_i32_0 = arith.constant 0 : i32
    %c0_i32_1 = arith.constant 0 : i32
    return %c0_i32, %c0_i32_0 : i32, i32
  }
  func.func @transform_5(%arg0: i32) -> (i32, i32) {
    %c0_i32 = arith.constant 0 : i32
    %c0_i32_0 = arith.constant 0 : i32
    %c0_i32_1 = arith.constant 0 : i32
    return %c0_i32, %c0_i32_0 : i32, i32
  }
  func.func @transform_6(%arg0: i32) -> (i32, i32) {
    %c0_i32 = arith.constant 0 : i32
    %c0_i32_0 = arith.constant 0 : i32
    %c0_i32_1 = arith.constant 0 : i32
    return %c0_i32, %c0_i32_0 : i32, i32
  }
  func.func @transform_7(%arg0: i32) -> (i32, i32, i32) {
    %c0_i32 = arith.constant 0 : i32
    %c0_i32_0 = arith.constant 0 : i32
    %c0_i32_1 = arith.constant 0 : i32
    return %arg0, %c0_i32, %c0_i32_0 : i32, i32, i32
  }
}

</mosaic_0001>

<bundles_post_ra>
// kernel: tpu_custom_call.1
= control target key start
LH: loop header
LB: loop body
LE: loop exit
PB: predicated region body
PF: predicated region fallthrough
CT: control target
= control target key end

     0   :  { %s1957_s0 = inlined_call_operand.hbm [shape: f32[2,16,128], index: 0, kind: input, shape index: {}]   ;;  %s1958_s1 = inlined_call_operand.vmem [shape: f32[2,8,64], index: 1, kind: input, shape index: {}]   ;;  %s1959_s2 = inlined_call_operand.hbm [shape: f32[384,128], index: 2, kind: input, shape index: {}]   ;;  %s1960_s3 = inlined_call_operand.hbm [shape: f32[4,384,128], index: 3, kind: input, shape index: {}]   ;;  %s1961_s4 = inlined_call_operand.vmem [shape: f32[5,128], index: 4, kind: input, shape index: {}]   ;;  %s1962_s5 = inlined_call_operand.vmem [shape: f32[16,8], index: 5, kind: input, shape index: {}]   ;;  %s1963_s6 = inlined_call_operand.hbm [shape: f32[64,128], index: 6, kind: input, shape index: {}]   ;;  %s1964_s7 = inlined_call_operand.hbm [shape: f32[2,16,128], index: 7, kind: output, shape index: {}]  }
   0x1   :  { %1967 = sst [smem:[#allocation15_spill]] %s1959_s2 }
   0x2   :  { %12 = vsyncpa [#allocation3], 0 }
   0x3   :  { %14 = vsyncpa [#allocation3 + $0x1], 0 }
   0x4   :  { %15 = vsyncpa [#allocation6], 0 }
   0x5   :  { %16 = vsyncpa [#allocation9], 0 }
   0x6   :  { %17 = vsyncpa [#allocation4], 0 }
   0x7   :  { %19 = vsyncpa [#allocation4 + $0x1], 0  ;;  %s1673_s24 = smov 0   ;;  %s1675_s25 = smov 0  }
   0x8   :  { %s1677_s26 = smov 0   ;;  %s1679_s27 = smov 0  }
   0x9 LB: > { %s1694_s28 = sadd.s32 4294967295, %s1624_s27   ;;  %s1312_s29 = sadd.s32 4294967294, %s1624_s27   ;;  %s1624_s27 = sphi %s1679_s27, %s1983_s27   ;;  %s1620_s26 = sphi %s1677_s26, %s1982_s26   ;;  %s1616_s25 = sphi %s1675_s25, %s1981_s25   ;;  %s1612_s24 = sphi %s1673_s24, %s1980_s24  }
   0xa   : > { %p45_p0 = scmp.ne.s32.totalorder %s1616_s25, %s1612_s24  ;;  %p46_p1 = scmp.eq.s32.totalorder %s1694_s28, 0 }
   0xb   : > { %p200_p2 = scmp.eq.s32.totalorder %s1694_s28, 1  ;;  %p206_p3 = scmp.eq.s32.totalorder %s1312_s29, 1 }
   0xc   : > { %p1703_p4 = por %p46_p1, %p45_p0  ;;  %p1313_p5 = scmp.ge.s32.totalorder %s1624_s27, 1 }
   0xd   : > { %p1708_p6 = por %p206_p3, %p45_p0  ;;  %p213_p7 = scmp.lt.s32.totalorder %s1624_s27, 3 }
   0xe   : > { %s1970_s2 = sld [smem:[#allocation15_spill]]  ;;  %s1626_s13 = smov [#allocation5]  }
   0xf   : > { %p1716_p8 = pnand %p1313_p5, %p213_p7  ;;  %s226_s14 = sshll.u32 %s1626_s13, 4  ;;  %s227_s14 = int_to_ptr.vmem [resolvable:$true] %s226_s14 }
  0x10   : > { %s238_s18 = sshll.u32 %s1960_s3, 4  ;;  %s1965_s19 = smov 128   ;;  %s239_s18 = int_to_ptr.hbm [resolvable:$true] %s238_s18 }
  0x11   : > { %p1365_p9 = pneg %p1716_p8  ;;  %s1966_s20 = smov 8  }
  0x12   : > { %s1629_s21 = smov [#allocation7]   ;;  %s258_s9 = sshll.u32 %s1963_s6, 4  ;;  %s259_s9 = int_to_ptr.hbm [resolvable:$true] %s258_s9 }
  0x13   : > { %p1724_p10 = pnand %p1365_p9, %p46_p1  ;;  %s240_s22 = sshll.u32 %s1629_s21, 4  ;;  %s241_s22 = int_to_ptr.vmem [resolvable:$true] %s240_s22 }
  0x14   : > { %s224_s11 = sshll.u32 %s1970_s2, 4  ;;  %s1630_s10 = smov [#allocation8]   ;;  %s225_s11 = int_to_ptr.hbm [resolvable:$true] %s224_s11 }
  0x15   : > { %1368 = dma.hbm_to_vmem [thread:$0]  (!%p1724_p10), %s225_s11, 6144, %s227_s14, [#allocation6], %s1965_s19, %s1965_s19, %s1966_s20  }
  0x16   : > { %1371 = dma.hbm_to_vmem [thread:$0]  (!%p1724_p10), %s239_s18, 24576, %s241_s22, [#allocation6], %s1965_s19, %s1965_s19, %s1966_s20  }
  0x17   : > { %s260_s11 = sshll.u32 %s1630_s10, 4  ;;  %s1746_s13 = sadd.s32 1, %s1624_s27   ;;  %s261_s11 = int_to_ptr.vmem [resolvable:$true] %s260_s11 }
  0x18   : > { %1374 = dma.hbm_to_vmem [thread:$0]  (!%p1724_p10), %s259_s9, 1024, %s261_s11, [#allocation9], %s1965_s19, %s1965_s19, %s1966_s20  }
  0x19   : > { %s29_s14 = ssub.s32 %s1624_s27, %s1746_s13  ;;  %s32_s16 = sadd.s32 1, %s1620_s26 }
  0x1a   : > { %p30_p12 = scmp.eq.s32.totalorder %s29_s14, 0  ;;  %p39_p13 = scmp.ne.s32.totalorder %s1620_s26, %s1616_s25 }
  0x1b   : > { %p40_p0 = scmp.eq.s32.totalorder %s1624_s27, 0  ;;  %p1386_p5 = scmp.lt.s32.totalorder %s1624_s27, 2 }
  0x1c   : > { %s1760_s17 = scalar_select %p30_p12, %s1620_s26, %s32_s16  }
  0x1d   : > { %p1764_p3 = por %p200_p2, %p39_p13  ;;  %s274_s21 = sand.u32 1, %s1620_s26  }
  0x1e   : > { %s1347_s15 = sshll.u32 %s1624_s27, 4  ;;  %p41_p7 = por %p40_p0, %p39_p13 }
  0x1f   : > { %s1318_s22 = sshll.u32 %s274_s21, 4  ;;  %s283_s9 = scalar_lea.hbm %s1957_s0, %s1347_s15 }
  0x20   : > { %s284_s10 = sshll.u32 %s283_s9, 4  ;;  %s278_s11 = scalar_lea.vmem [#allocation2], %s1318_s22  ;;  %s285_s10 = int_to_ptr.hbm [resolvable:$true] %s284_s10 }
  0x21   : > { %s286_s14 = sshll.u32 %s278_s11, 4  ;;  %p1774_p9 = pnand %p1386_p5, %p41_p7  ;;  %s287_s14 = int_to_ptr.vmem [resolvable:$true] %s286_s14 }
  0x22   : > { %s275_s19 = scalar_lea.sflag [#allocation3], %s274_s21  ;;  %s1520_s20 = sshra.s32 %s285_s10, 4  ;;  %s1521_s20 = int_to_ptr.hbm [resolvable:$true] %s1520_s20 }
  0x23   : > { %s1522_s2 = scalar_lea.hbm %s1521_s20, 16  ;;  %p1524_p10 = pneg %p1774_p9 }
  0x24   : > { %p1523_p2 = scmp.ne.s32.totalorder %s1521_s20, %s1522_s2  ;;  %s1527_s22 = scalar_lea.hbm %s1957_s0, 32 }
  0x25   : > { %p1528_p0 = scmp.lt.s32.totalorder %s1521_s20, %s1957_s0  ;;  %p1529_p5 = scmp.lt.s32.totalorder %s1527_s22, %s1522_s2 }
  0x26   : > { %p1525_p12 = pnand %p1524_p10, %p1523_p2 }
  0x27   : > { %p1530_p7 = por %p1529_p5, %p1528_p0 }
  0x28   : > { %p1526_p13 = pneg %p1525_p12 }
  0x2a   : > { %p1531_p11 = pnand %p1530_p7, %p1526_p13 }
  0x2c   : > { %1534 = shalt.err (!%p1531_p11)
}
  0x2d   : > { %s1975_s21 = smov 8   ;;  %s1976_s11 = smov 128  }
  0x2e   : > { %1378 = dma.hbm_to_vmem [thread:$0]  (!%p1774_p9), %s285_s10, 256, %s287_s14, %s275_s19, %s1976_s11, %s1976_s11, %s1975_s21  }
  0x2f   : > { %305 = sbr.rel (%p1716_p8) target bundleno = 972 (0x3cc), region = 48  ;;  %s1794_s15 = sand.u32 (!%p1716_p8), 1, %s1616_s25  }
  0x30   : > { %s1322_s2 = sshll.u32 (!%p1716_p8), %s1794_s15, 4  ;;  %s308_s20 = scalar_lea.sflag (!%p1716_p8), [#allocation3], %s1794_s15 }
  0x31   : > { %s1800_s23 = scalar_lea.vmem (!%p1716_p8), [#allocation2], %s1322_s2 }
  0x34   : > { %1595 = dma.done.wait (%p1703_p4), %s308_s20, 256  }
  0x35   : > { %1597 = vsyncadd (%p1703_p4), %s308_s20, 4294967040 }
  0x36   : > { %1599 = dma.done.wait (%p46_p1), [#allocation6], 30720  }
  0x37   : > { %1601 = vsyncadd (%p46_p1), [#allocation6], 4294936576 }
  0x38   : > { %1603 = dma.done.wait (%p46_p1), [#allocation9], 1024  }
  0x39   : > { %1605 = vsyncadd (%p46_p1), [#allocation9], 4294966272  ;;  %v416_v0 = vld [vmem:[#allocation5 + $0x178] sm:$0xff]  ;;  %v415_v2 = vld [vmem:[#allocation5 + $0x170] sm:$0xff]  ;;  %vm419_vm0 = vcmask 1040384   ;;  %vm438_vm1 = vcmask 1045504  }
  0x3a   : > { %v384_v1 = vld [vmem:[#allocation5 + $0x78] sm:$0xff]  ;;  %493 = vmatpush.msra.mxu2 %v416_v0  ;;  %v383_v3 = vld [vmem:[#allocation5 + $0x70] sm:$0xff]  ;;  %v414_v5 = vld [vmem:[#allocation5 + $0x168] sm:$0xff]  ;;  %vm430_vm2 = vcmask 1046528   ;;  %p362_p1 = scmp.lt.s32.totalorder %s1694_s28, 1  ;;  %vm814_vm4 = vcmask 64512  }
  0x3b   : > { %447 = vmatpush.msra.mxu0 %v384_v1  ;;  %v400_v4 = vld [vmem:[#allocation5 + $0xf8] sm:$0xff]  ;;  %v382_v6 = vld [vmem:[#allocation5 + $0x68] sm:$0xff]  ;;  %v399_v7 = vld [vmem:[#allocation5 + $0xf0] sm:$0xff]  ;;  %vm852_vm5 = vcmask 523264   ;;  %s1348_s20 = sshll.u32 %s1694_s28, 4  ;;  %s1570_s9 = scalar_lea.hbm %s1964_s7, 32 }
  0x3c   : > { %470 = vmatpush.msra.mxu1 %v400_v4  ;;  %494 = vmatpush.msra.mxu2 %v415_v2  ;;  %v398_v8 = vld [vmem:[#allocation5 + $0xe8] sm:$0xff]  ;;  %v413_v9 = vld [vmem:[#allocation5 + $0x160] sm:$0xff]  ;;  %v412_v12 = vld [vmem:[#allocation5 + $0x158] sm:$0xff]  ;;  %s363_s19 = scalar_select %p362_p1, %s1694_s28, 1 }
  0x3d   : > { %448 = vmatpush.msra.mxu0 %v383_v3  ;;  %v381_v10 = vld [vmem:[#allocation5 + $0x60] sm:$0xff]  ;;  %v380_v13 = vld [vmem:[#allocation5 + $0x58] sm:$0xff]  ;;  %v411_v15 = vld [vmem:[#allocation5 + $0x150] sm:$0xff]  ;;  %s1194_s12 = scalar_lea.hbm %s1964_s7, %s1348_s20  ;;  %s1183_s28 = scalar_lea.sflag [#allocation4], %s1794_s15 }
  0x3e   : > { %471 = vmatpush.msra.mxu1 %v399_v7  ;;  %495 = vmatpush.msra.mxu2 %v414_v5  ;;  %v397_v11 = vld [vmem:[#allocation5 + $0xe0] sm:$0xff]  ;;  %v396_v14 = vld [vmem:[#allocation5 + $0xd8] sm:$0xff]  ;;  %v379_v16 = vld [vmem:[#allocation5 + $0x50] sm:$0xff]  ;;  %s1327_s10 = sshll.u32 %s363_s19, 3  ;;  %s361_s19 = scalar_lea.vmem [#allocation10], %s1322_s2 }
  0x3f   : > { %449 = vmatpush.msra.mxu0 %v382_v6  ;;  %v395_v17 = vld [vmem:[#allocation5 + $0xd0] sm:$0xff]  ;;  %v410_v18 = vld [vmem:[#allocation5 + $0x148] sm:$0xff]  ;;  %v409_v21 = vld [vmem:[#allocation5 + $0x140] sm:$0xff]  ;;  %s365_s22 = scalar_lea.vmem %s1958_s1, %s1327_s10  ;;  %s1195_s10 = sshll.u32 %s361_s19, 4  ;;  %s1196_s10 = int_to_ptr.vmem [resolvable:$true] %s1195_s10 }
  0x40   : > { %472 = vmatpush.msra.mxu1 %v398_v8  ;;  %496 = vmatpush.msra.mxu2 %v413_v9  ;;  %v378_v19 = vld [vmem:[#allocation5 + $0x48] sm:$0xff]  ;;  %v377_v22 = vld [vmem:[#allocation5 + $0x40] sm:$0xff]  ;;  %v408_v24 = vld [vmem:[#allocation5 + $0x138] sm:$0xff]  ;;  %s1197_s14 = sshll.u32 %s1194_s12, 4  ;;  %s1198_s14 = int_to_ptr.hbm [resolvable:$true] %s1197_s14 }
  0x41   : > { %450 = vmatpush.msra.mxu0 %v381_v10  ;;  %v394_v20 = vld [vmem:[#allocation5 + $0xc8] sm:$0xff]  ;;  %v393_v23 = vld [vmem:[#allocation5 + $0xc0] sm:$0xff]  ;;  %v376_v25 = vld [vmem:[#allocation5 + $0x38] sm:$0xff]  ;;  %s1564_s16 = sshra.s32 %s1198_s14, 4  ;;  %s1565_s16 = int_to_ptr.hbm [resolvable:$true] %s1564_s16 }
  0x42   : > { %473 = vmatpush.msra.mxu1 %v397_v11  ;;  %497 = vmatpush.msra.mxu2 %v412_v12  ;;  %v392_v26 = vld [vmem:[#allocation5 + $0xb8] sm:$0xff]  ;;  %v366_v27 = vld [vmem:[%s1800_s23] sm:$0xff]  ;;  %v406_v34 = vld [vmem:[#allocation5 + $0x128] sm:$0xff]  ;;  %p1571_p9 = scmp.lt.s32.totalorder %s1565_s16, %s1964_s7 }
  0x43   : > { %451 = vmatpush.msra.mxu0 %v380_v13  ;;  %v1816_v28 = vld [vmem:[%s1800_s23 + $0x8] sm:$0xff]  ;;  %v407_v29 = vld [vmem:[#allocation5 + $0x130] sm:$0xff]  ;;  %v1818_v36 = vrot.slane %v366_v27, 7  ;;  %v405_v40 = vld [vmem:[#allocation5 + $0x120] sm:$0xff] }
  0x44   : > { %474 = vmatpush.msra.mxu1 %v396_v14  ;;  %498 = vmatpush.msra.mxu2 %v411_v15  ;;  %v375_v30 = vld [vmem:[#allocation5 + $0x30] sm:$0xff]  ;;  %v533_v32 = vld [vmem:[#allocation7 + $0x78] sm:$0xff]  ;;  %v374_v35 = vld [vmem:[#allocation5 + $0x28] sm:$0xff]  ;;  %v421_v37 = vrot.slane %v1816_v28, 7 }
  0x45   : > { %452 = vmatpush.msra.mxu0 %v379_v16  ;;  %v391_v31 = vld [vmem:[#allocation5 + $0xb0] sm:$0xff]  ;;  %593 = vmatpush.msra.mxu3 %v533_v32  ;;  %v390_v38 = vld [vmem:[#allocation5 + $0xa8] sm:$0xff]  ;;  %v373_v41 = vld [vmem:[#allocation5 + $0x20] sm:$0xff]  ;;  %v426_v47 = vsel %vm419_vm0, 0.0, %v1818_v36 }
  0x46   : > { %475 = vmatpush.msra.mxu1 %v395_v17  ;;  %499 = vmatpush.msra.mxu2 %v410_v18  ;;  %v532_v33 = vld [vmem:[#allocation7 + $0x70] sm:$0xff]  ;;  %v531_v39 = vld [vmem:[#allocation7 + $0x68] sm:$0xff]  ;;  %v389_v42 = vld [vmem:[#allocation5 + $0xa0] sm:$0xff]  ;;  %v1823_v46 = vsel %vm419_vm0, %v1818_v36, %v421_v37  ;;  %v439_v53 = vrot.slane %v426_v47, 2  ;;  %v431_v59 = vrot.slane %v426_v47, 1  ;;  %v427_v3 = vsel %vm419_vm0, %v421_v37, 0.0 }
  0x47   : > { %453 = vmatpush.msra.mxu0 %v378_v19  ;;  %594 = vmatpush.msra.mxu3 %v532_v33  ;;  %v530_v43 = vld [vmem:[#allocation7 + $0x60] sm:$0xff]  ;;  %v404_v44 = vld [vmem:[#allocation5 + $0x118] sm:$0xff]  ;;  %v403_v50 = vld [vmem:[#allocation5 + $0x110] sm:$0xff]  ;;  %v440_v54 = vrot.slane %v1823_v46, 2  ;;  %v432_v60 = vrot.slane %v1823_v46, 1  ;;  %v442_v9 = vrot.slane %v427_v3, 2 }
  0x48   : > { %476 = vmatpush.msra.mxu1 %v394_v20  ;;  %500 = vmatpush.msra.mxu2 %v409_v21  ;;  %v372_v45 = vld [vmem:[#allocation5 + $0x18] sm:$0xff]  ;;  %v371_v51 = vld [vmem:[#allocation5 + $0x10] sm:$0xff]  ;;  %v402_v56 = vld [vmem:[#allocation5 + $0x108] sm:$0xff]  ;;  %v434_v13 = vrot.slane %v427_v3, 1 }
  0x49   : > { %454 = vmatpush.msra.mxu0 %v377_v22  ;;  %595 = vmatpush.msra.mxu3 %v531_v39  ;;  %v388_v48 = vld [vmem:[#allocation5 + $0x98] sm:$0xff]  ;;  %v387_v52 = vld [vmem:[#allocation5 + $0x90] sm:$0xff]  ;;  %v370_v57 = vld [vmem:[#allocation5 + $0x8] sm:$0xff]  ;;  %v441_v0 = vsel %vm438_vm1, %v439_v53, %v440_v54  ;;  %v433_v5 = vsel %vm430_vm2, %v431_v59, %v432_v60  ;;  %v443_v17 = vsel %vm438_vm1, %v440_v54, %v442_v9 }
  0x4a   : > { %477 = vmatpush.msra.mxu1 %v393_v23  ;;  %501 = vmatpush.msra.mxu2 %v408_v24  ;;  %v529_v49 = vld [vmem:[#allocation7 + $0x58] sm:$0xff]  ;;  %v528_v55 = vld [vmem:[#allocation7 + $0x50] sm:$0xff]  ;;  %v386_v58 = vld [vmem:[#allocation5 + $0x88] sm:$0xff]  ;;  %v435_v19 = vsel %vm430_vm2, %v432_v60, %v434_v13 }
  0x4b   : > { %455 = vmatpush.msra.mxu0 %v376_v25  ;;  %596 = vmatpush.msra.mxu3 %v530_v43  ;;  %v527_v61 = vld [vmem:[#allocation7 + $0x48] sm:$0xff]  ;;  %v401_v62 = vld [vmem:[#allocation5 + $0x100] sm:$0xff]  ;;  %vm1831_vm3 = vmneg %vm419_vm0 }
  0x4c   : > { %478 = vmatpush.msra.mxu1 %v392_v26  ;;  %502 = vmatpush.msra.mxu2 %v407_v29  ;;  %v369_v63 = vld [vmem:[#allocation5] sm:$0xff]  ;;  %v549_v4 = vld [vmem:[#allocation7 + $0xf8] sm:$0xff]  ;;  %v548_v8 = vld [vmem:[#allocation7 + $0xf0] sm:$0xff] }
  0x4d   : > { %456 = vmatpush.msra.mxu0 %v375_v30  ;;  %597 = vmatpush.msra.mxu3 %v529_v49  ;;  %v385_v2 = vld [vmem:[#allocation5 + $0x80] sm:$0xff]  ;;  %v565_v7 = vld [vmem:[#allocation7 + $0x178] sm:$0xff]  ;;  %v564_v11 = vld [vmem:[#allocation7 + $0x170] sm:$0xff] }
  0x4e   : > { %479 = vmatpush.msra.mxu1 %v391_v31  ;;  %503 = vmatpush.msra.mxu2 %v406_v34  ;;  %v526_v6 = vld [vmem:[#allocation7 + $0x40] sm:$0xff]  ;;  %v525_v10 = vld [vmem:[#allocation7 + $0x38] sm:$0xff]  ;;  %v547_v12 = vld [vmem:[#allocation7 + $0xe8] sm:$0xff] }
  0x4f   : > { %457 = vmatpush.msra.mxu0 %v374_v35  ;;  %598 = vmatpush.msra.mxu3 %v528_v55  ;;  %v524_v14 = vld [vmem:[#allocation7 + $0x30] sm:$0xff]  ;;  %v563_v15 = vld [vmem:[#allocation7 + $0x168] sm:$0xff]  ;;  %v546_v16 = vld [vmem:[#allocation7 + $0xe0] sm:$0xff] }
  0x50   : > { %480 = vmatpush.msra.mxu1 %v390_v38  ;;  %504 = vmatpush.msra.mxu2 %v405_v40  ;;  %v562_v18 = vld [vmem:[#allocation7 + $0x160] sm:$0xff]  ;;  %v523_v20 = vld [vmem:[#allocation7 + $0x28] sm:$0xff]  ;;  %v545_v21 = vld [vmem:[#allocation7 + $0xd8] sm:$0xff] }
  0x51   : > { %458 = vmatpush.msra.mxu0 %v373_v41  ;;  %599 = vmatpush.msra.mxu3 %v527_v61  ;;  %v561_v22 = vld [vmem:[#allocation7 + $0x158] sm:$0xff]  ;;  %v522_v23 = vld [vmem:[#allocation7 + $0x20] sm:$0xff]  ;;  %v544_v24 = vld [vmem:[#allocation7 + $0xd0] sm:$0xff] }
  0x52   : > { %481 = vmatpush.msra.mxu1 %v389_v42  ;;  %505 = vmatpush.msra.mxu2 %v404_v44  ;;  %v560_v25 = vld [vmem:[#allocation7 + $0x150] sm:$0xff]  ;;  %v521_v26 = vld [vmem:[#allocation7 + $0x18] sm:$0xff]  ;;  %v543_v27 = vld [vmem:[#allocation7 + $0xc8] sm:$0xff] }
  0x53   : > { %459 = vmatpush.msra.mxu0 %v372_v45  ;;  %600 = vmatpush.msra.mxu3 %v526_v6  ;;  %v559_v28 = vld [vmem:[#allocation7 + $0x148] sm:$0xff]  ;;  %v520_v29 = vld [vmem:[#allocation7 + $0x10] sm:$0xff]  ;;  %v542_v30 = vld [vmem:[#allocation7 + $0xc0] sm:$0xff] }
  0x54   : > { %482 = vmatpush.msra.mxu1 %v388_v48  ;;  %506 = vmatpush.msra.mxu2 %v403_v50  ;;  %v558_v31 = vld [vmem:[#allocation7 + $0x140] sm:$0xff]  ;;  %v519_v32 = vld [vmem:[#allocation7 + $0x8] sm:$0xff]  ;;  %v541_v33 = vld [vmem:[#allocation7 + $0xb8] sm:$0xff] }
  0x55   : > { %460 = vmatpush.msra.mxu0 %v371_v51  ;;  %601 = vmatpush.msra.mxu3 %v525_v10  ;;  %v557_v34 = vld [vmem:[#allocation7 + $0x138] sm:$0xff]  ;;  %v518_v35 = vld [vmem:[#allocation7] sm:$0xff]  ;;  %v556_v37 = vld [vmem:[#allocation7 + $0x130] sm:$0xff] }
  0x56   : > { %483 = vmatpush.msra.mxu1 %v387_v52  ;;  %507 = vmatpush.msra.mxu2 %v402_v56  ;;  %v539_v38 = vld [vmem:[#allocation7 + $0xa8] sm:$0xff]  ;;  %v538_v40 = vld [vmem:[#allocation7 + $0xa0] sm:$0xff]  ;;  %v537_v42 = vld [vmem:[#allocation7 + $0x98] sm:$0xff] }
  0x57   : > { %461 = vmatpush.msra.mxu0 %v370_v57  ;;  %602 = vmatpush.msra.mxu3 %v524_v14  ;;  %v555_v39 = vld [vmem:[#allocation7 + $0x128] sm:$0xff]  ;;  %v554_v41 = vld [vmem:[#allocation7 + $0x120] sm:$0xff]  ;;  %v553_v43 = vld [vmem:[#allocation7 + $0x118] sm:$0xff] }
  0x58   : > { %484 = vmatpush.msra.mxu1 %v386_v58  ;;  %508 = vmatpush.msra.mxu2 %v401_v62  ;;  %v536_v44 = vld [vmem:[#allocation7 + $0x90] sm:$0xff]  ;;  %v551_v47 = vld [vmem:[#allocation7 + $0x108] sm:$0xff]  ;;  %v534_v48 = vld [vmem:[#allocation7 + $0x80] sm:$0xff] }
  0x59   : > { %462 = vmatpush.msra.mxu0 %v369_v63  ;;  %509 = vmatmul.f32.vlgmr.msra.gmra.mxu2 %v441_v0  ;;  %v552_v45 = vld [vmem:[#allocation7 + $0x110] sm:$0xff]  ;;  %v550_v49 = vld [vmem:[#allocation7 + $0x100] sm:$0xff]  ;;  %v680_v54 = vld [vmem:[#allocation7 + $0x1f8] sm:$0xff] }
  0x5a   : > { %1329 = vmatmul.msk.f32.vlgmr.msra.gmra.mxu0 %vm1831_vm3, %v1818_v36  ;;  %485 = vmatpush.msra.mxu1 %v385_v2  ;;  %v540_v36 = vld [vmem:[#allocation7 + $0xb0] sm:$0xff]  ;;  %v1846_v50 = vld [vmem:[%s1961_s4] sm:$0x1f]  ;;  %v678_v58 = vld [vmem:[#allocation7 + $0x1e8] sm:$0xff] }
  0x5b   : > { %616 = vmatpush.msrb.mxu0 %v549_v4  ;;  %486 = vmatmul.f32.vlgmr.msra.gmra.mxu1 %v433_v5  ;;  %v446_v51 = vperm.slane %v1846_v50, 0  ;;  %v679_v55 = vld [vmem:[#allocation7 + $0x1f0] sm:$0xff]  ;;  %v696_v59 = vld [vmem:[#allocation7 + $0x278] sm:$0xff]  ;;  %v677_v63 = vld [vmem:[#allocation7 + $0x1e0] sm:$0xff] }
  0x5c   : > { %639 = vmatpush.msrb.mxu1 %v565_v7  ;;  %603 = vmatpush.msra.mxu3 %v523_v20  ;;  %v712_v60 = vld [vmem:[#allocation7 + $0x2f8] sm:$0xff]  ;;  %v695_v61 = vld [vmem:[#allocation7 + $0x270] sm:$0xff] }
  0x5d   : > { %617 = vmatpush.msrb.mxu0 %v548_v8  ;;  %740 = vmatpush.msrb.mxu2 %v680_v54  ;;  %v711_v62 = vld [vmem:[#allocation7 + $0x2f0] sm:$0xff]  ;;  %v676_v3 = vld [vmem:[#allocation7 + $0x1d8] sm:$0xff] }
  0x5e   : > { %640 = vmatpush.msrb.mxu1 %v564_v11  ;;  %604 = vmatpush.msra.mxu3 %v522_v23  ;;  %v675_v7 = vld [vmem:[#allocation7 + $0x1d0] sm:$0xff]  ;;  %v674_v11 = vld [vmem:[#allocation7 + $0x1c8] sm:$0xff] }
  0x5f   : > { %618 = vmatpush.msrb.mxu0 %v547_v12  ;;  %741 = vmatpush.msrb.mxu2 %v679_v55  ;;  %v673_v12 = vld [vmem:[#allocation7 + $0x1c0] sm:$0xff]  ;;  %v703_v54 = vld [vmem:[#allocation7 + $0x2b0] sm:$0xff]  ;;  %v686_v55 = vld [vmem:[#allocation7 + $0x228] sm:$0xff] }
  0x60   : > { %641 = vmatpush.msrb.mxu1 %v563_v15  ;;  %605 = vmatpush.msra.mxu3 %v521_v26 }
  0x61   : > { %619 = vmatpush.msrb.mxu0 %v546_v16  ;;  %512 = vmatmul.f32.gmra.mxu2 %v443_v17 }
  0x62   : > { %466 = vmatmul.f32.gmra.mxu0 %v1823_v46  ;;  %642 = vmatpush.msrb.mxu1 %v562_v18  ;;  %v535_v46 = vld [vmem:[#allocation7 + $0x88] sm:$0xff] }
  0x63   : > { %489 = vmatmul.f32.gmra.mxu1 %v435_v19  ;;  %620 = vmatpush.msrb.mxu0 %v545_v21 }
  0x64   : > { %643 = vmatpush.msrb.mxu1 %v561_v22  ;;  %606 = vmatpush.msra.mxu3 %v520_v29 }
  0x65   : > { %621 = vmatpush.msrb.mxu0 %v544_v24  ;;  %742 = vmatpush.msrb.mxu2 %v678_v58  ;;  %v701_v58 = vld [vmem:[#allocation7 + $0x2a0] sm:$0xff] }
  0x66   : > { %644 = vmatpush.msrb.mxu1 %v560_v25  ;;  %607 = vmatpush.msra.mxu3 %v519_v32  ;;  %v710_v32 = vld [vmem:[#allocation7 + $0x2e8] sm:$0xff] }
  0x67   : > { %622 = vmatpush.msrb.mxu0 %v543_v27  ;;  %743 = vmatpush.msrb.mxu2 %v677_v63  ;;  %v682_v63 = vld [vmem:[#allocation7 + $0x208] sm:$0xff] }
  0x68   : > { %645 = vmatpush.msrb.mxu1 %v559_v28  ;;  %608 = vmatpush.msra.mxu3 %v518_v35  ;;  %v709_v35 = vld [vmem:[#allocation7 + $0x2e0] sm:$0xff] }
  0x69   : > { %623 = vmatpush.msrb.mxu0 %v542_v30  ;;  %744 = vmatpush.msrb.mxu2 %v676_v3  ;;  %v672_v30 = vld [vmem:[#allocation7 + $0x1b8] sm:$0xff]  ;;  %v811_v3 = vld [vmem:[%s365_s22] sm:$0xff]  ;;  %s1566_s22 = scalar_lea.hbm %s1565_s16, 16 }
  0x6a   : > { %646 = vmatpush.msrb.mxu1 %v558_v31  ;;  %763 = vmatpush.msrb.mxu3 %v696_v59  ;;  %v694_v31 = vld [vmem:[#allocation7 + $0x268] sm:$0xff]  ;;  %v684_v59 = vld [vmem:[#allocation7 + $0x218] sm:$0xff]  ;;  %p1567_p4 = scmp.ne.s32.totalorder %s1565_s16, %s1566_s22  ;;  %p1572_p2 = scmp.lt.s32.totalorder %s1570_s9, %s1566_s22 }
  0x6b   : > { %624 = vmatpush.msrb.mxu0 %v541_v33  ;;  %745 = vmatpush.msrb.mxu2 %v675_v7  ;;  %v671_v33 = vld [vmem:[#allocation7 + $0x1b0] sm:$0xff]  ;;  %v592_v7 = vperm.slane %v1846_v50, 1 }
  0x6c   : > { %647 = vmatpush.msrb.mxu1 %v557_v34  ;;  %764 = vmatpush.msrb.mxu3 %v695_v61  ;;  %v693_v34 = vld [vmem:[#allocation7 + $0x260] sm:$0xff]  ;;  %v683_v61 = vld [vmem:[#allocation7 + $0x210] sm:$0xff]  ;;  %p1568_p8 = pnand %p1567_p4, %p1764_p3  ;;  %p1573_p10 = por %p1572_p2, %p1571_p9 }
  0x6d   : > { %625 = vmatpush.msrb.mxu0 %v540_v36  ;;  %746 = vmatpush.msrb.mxu2 %v674_v11  ;;  %v670_v36 = vld [vmem:[#allocation7 + $0x1a8] sm:$0xff] }
  0x6e   : > { %648 = vmatpush.msrb.mxu1 %v556_v37  ;;  %765 = vmatpush.msrb.mxu3 %v694_v31  ;;  %v692_v37 = vld [vmem:[#allocation7 + $0x258] sm:$0xff]  ;;  %p1569_p11 = pneg %p1568_p8 }
  0x6f   : > { %626 = vmatpush.msrb.mxu0 %v539_v38  ;;  %747 = vmatpush.msrb.mxu2 %v673_v12  ;;  %v708_v38 = vld [vmem:[#allocation7 + $0x2d8] sm:$0xff] }
  0x70   : > { %649 = vmatpush.msrb.mxu1 %v555_v39  ;;  %766 = vmatpush.msrb.mxu3 %v693_v34  ;;  %v669_v39 = vld [vmem:[#allocation7 + $0x1a0] sm:$0xff]  ;;  %p1574_p12 = pnand %p1573_p10, %p1569_p11 }
  0x71   : > { %627 = vmatpush.msrb.mxu0 %v538_v40  ;;  %748 = vmatpush.msrb.mxu2 %v672_v30  ;;  %v691_v40 = vld [vmem:[#allocation7 + $0x250] sm:$0xff] }
  0x72   : > { %650 = vmatpush.msrb.mxu1 %v554_v41  ;;  %767 = vmatpush.msrb.mxu3 %v692_v37  ;;  %v707_v41 = vld [vmem:[#allocation7 + $0x2d0] sm:$0xff] }
  0x73   : > { %628 = vmatpush.msrb.mxu0 %v537_v42  ;;  %749 = vmatpush.msrb.mxu2 %v671_v33  ;;  %v668_v42 = vld [vmem:[#allocation7 + $0x198] sm:$0xff]  ;;  %v812_v33 = vld [vmem:[%s1962_s5] sm:$0xff] }
  0x74   : > { %651 = vmatpush.msrb.mxu1 %v553_v43  ;;  %768 = vmatpush.msrb.mxu3 %v691_v40  ;;  %v690_v43 = vld [vmem:[#allocation7 + $0x248] sm:$0xff]  ;;  %v850_v40 = vld [vmem:[#allocation8 + $0x30] sm:$0xff] }
  0x75   : > { %629 = vmatpush.msrb.mxu0 %v536_v44  ;;  %750 = vmatpush.msrb.mxu2 %v670_v36  ;;  %v706_v44 = vld [vmem:[#allocation7 + $0x2c8] sm:$0xff] }
  0x76   : > { %652 = vmatpush.msrb.mxu1 %v552_v45  ;;  %769 = vmatpush.msrb.mxu3 %v690_v43  ;;  %v667_v45 = vld [vmem:[#allocation7 + $0x190] sm:$0xff]  ;;  %v847_v43 = vld [vmem:[#allocation8 + $0x18] sm:$0xff] }
  0x77   : > { %630 = vmatpush.msrb.mxu0 %v535_v46  ;;  %751 = vmatpush.msrb.mxu2 %v669_v39  ;;  %v689_v46 = vld [vmem:[#allocation7 + $0x240] sm:$0xff]  ;;  %v851_v39 = vld [vmem:[#allocation8 + $0x38] sm:$0xff] }
  0x78   : > { %653 = vmatpush.msrb.mxu1 %v551_v47  ;;  %v705_v47 = vld [vmem:[#allocation7 + $0x2c0] sm:$0xff]  ;;  %770 = vmatpush.msrb.mxu3 %v689_v46 }
  0x79   : > { %631 = vmatpush.msrb.mxu0 %v534_v48  ;;  %752 = vmatpush.msrb.mxu2 %v668_v42  ;;  %v666_v48 = vld [vmem:[#allocation7 + $0x188] sm:$0xff]  ;;  %v848_v42 = vld [vmem:[#allocation8 + $0x20] sm:$0xff] }
  0x7a   : > { %654 = vmatpush.msrb.mxu1 %v550_v49  ;;  %v688_v49 = vld [vmem:[#allocation7 + $0x238] sm:$0xff]  ;;  %v844_v46 = vld [vmem:[#allocation8] sm:$0xff] }
  0x7b   : > { %786 = vmatpush.msra.mxu0 %v712_v60  ;;  %753 = vmatpush.msrb.mxu2 %v667_v45  ;;  %v700_v60 = vld [vmem:[#allocation7 + $0x298] sm:$0xff]  ;;  %v845_v45 = vld [vmem:[#allocation8 + $0x8] sm:$0xff] }
  0x7c   : > { %771 = vmatpush.msrb.mxu3 %v688_v49  ;;  %v900_v49 = vld [vmem:[#allocation7 + $0x368] sm:$0xff] }
  0x7d   : > { %787 = vmatpush.msra.mxu0 %v711_v62  ;;  %754 = vmatpush.msrb.mxu2 %v666_v48  ;;  %v699_v62 = vld [vmem:[#allocation7 + $0x290] sm:$0xff] }
  0x7e   : > { %v901_v48 = vld [vmem:[#allocation7 + $0x370] sm:$0xff] }
  0x7f   : > { %788 = vmatpush.msra.mxu0 %v710_v32 }
  0x81   : > { %789 = vmatpush.msra.mxu0 %v709_v35 }
  0x83   : > { %790 = vmatpush.msra.mxu0 %v708_v38  ;;  %v813_v38 = vld [vmem:[%s1962_s5 + $0x8] sm:$0xff] }
  0x85   : > { %791 = vmatpush.msra.mxu0 %v707_v41  ;;  %v849_v41 = vld [vmem:[#allocation8 + $0x28] sm:$0xff] }
  0x87   : > { %792 = vmatpush.msra.mxu0 %v706_v44  ;;  %v846_v44 = vld [vmem:[#allocation8 + $0x10] sm:$0xff] }
  0x89   : > { %793 = vmatpush.msra.mxu0 %v705_v47  ;;  %v902_v47 = vld [vmem:[#allocation7 + $0x378] sm:$0xff] }
  0xd7   : > { %v464_v52 = vpop.f32.mrf.mxu0 }
  0xd8   : > { %v465_v53 = vadd.f32 %v464_v52, %v446_v51  ;;  %v487_v56 = vpop.f32.mrf.mxu1  ;;  %v665_v52 = vld [vmem:[#allocation7 + $0x180] sm:$0xff] }
  0xd9   : > { %755 = vmatpush.msrb.mxu2 %v665_v52  ;;  %v934_v52 = vld [vmem:[#allocation7 + $0x478] sm:$0xff] }
  0xda   : > { %v488_v57 = vadd.f32 %v487_v56, %v465_v53  ;;  %v687_v53 = vld [vmem:[#allocation7 + $0x230] sm:$0xff]  ;;  %v702_v56 = vld [vmem:[#allocation7 + $0x2a8] sm:$0xff] }
  0xdb   : > { %772 = vmatpush.msrb.mxu3 %v687_v53  ;;  %836 = vmatpush.msra.mxu2 %v811_v3  ;;  %v917_v53 = vld [vmem:[#allocation7 + $0x3f0] sm:$0xff]  ;;  %v896_v3 = vld [vmem:[#allocation7 + $0x348] sm:$0xff] }
  0xdc   : > { %v510_v0 = vpop.f32.mrf.mxu2 }
  0xdd   : > { %v1849_v2 = vadd.f32 %v510_v0, %v488_v57  ;;  %773 = vmatpush.msrb.mxu3 %v686_v55  ;;  %v685_v57 = vld [vmem:[#allocation7 + $0x220] sm:$0xff]  ;;  %v698_v0 = vld [vmem:[#allocation7 + $0x288] sm:$0xff] }
  0xde   : > { %v899_v55 = vld [vmem:[#allocation7 + $0x360] sm:$0xff] }
  0xdf   : > { %v467_v4 = vpop.f32.mrf.mxu0  ;;  %v516_v5 = vmax.f32 %v1849_v2, 0.0  ;;  %774 = vmatpush.msrb.mxu3 %v685_v57  ;;  %v932_v57 = vld [vmem:[#allocation7 + $0x468] sm:$0xff] }
  0xe0   : > { %v468_v6 = vadd.f32 %v467_v4, %v446_v51  ;;  %v490_v8 = vpop.f32.mrf.mxu1  ;;  %v704_v51 = vld [vmem:[#allocation7 + $0x2b8] sm:$0xff]  ;;  %v681_v4 = vld [vmem:[#allocation7 + $0x200] sm:$0xff] }
  0xe1   : > { %v568_v9 = vrot.slane %v516_v5, 7  ;;  %794 = vmatpush.msra.mxu0 %v704_v51  ;;  %775 = vmatpush.msrb.mxu3 %v684_v59  ;;  %v697_v5 = vld [vmem:[#allocation7 + $0x280] sm:$0xff]  ;;  %v918_v51 = vld [vmem:[#allocation7 + $0x3f8] sm:$0xff] }
  0xe2   : > { %v491_v10 = vadd.f32 %v490_v8, %v468_v6  ;;  %985 = vmatpush.msra.mxu1 %v918_v51  ;;  %v898_v59 = vld [vmem:[#allocation7 + $0x358] sm:$0xff] }
  0xe3   : > { %1331 = vmatmul.msk.f32.vlgmr.msra.gmra.mxu3 %vm1831_vm3, %v568_v9  ;;  %v574_v17 = vsel %vm419_vm0, 0.0, %v568_v9  ;;  %795 = vmatpush.msra.mxu0 %v703_v54  ;;  %v933_v54 = vld [vmem:[#allocation7 + $0x470] sm:$0xff] }
  0xe4   : > { %v513_v13 = vpop.f32.mrf.mxu2  ;;  %v578_v21 = vrot.slane %v574_v17, 1  ;;  %v585_v22 = vrot.slane %v574_v17, 2  ;;  %776 = vmatpush.msrb.mxu3 %v683_v61  ;;  %986 = vmatpush.msra.mxu1 %v917_v53  ;;  %v931_v61 = vld [vmem:[#allocation7 + $0x460] sm:$0xff] }
  0xe5   : > { %v1854_v14 = vadd.f32 %v513_v13, %v491_v10  ;;  %796 = vmatpush.msra.mxu0 %v702_v56  ;;  %v916_v56 = vld [vmem:[#allocation7 + $0x3e8] sm:$0xff]  ;;  %v1046_v53 = vld [vmem:[#allocation7 + $0x4e0] sm:$0xff] }
  0xe6   : > { %777 = vmatpush.msrb.mxu3 %v682_v63  ;;  %987 = vmatpush.msra.mxu1 %v916_v56  ;;  %v914_v63 = vld [vmem:[#allocation7 + $0x3d8] sm:$0xff] }
  0xe7   : > { %v517_v15 = vmax.f32 %v1854_v14, 0.0  ;;  %797 = vmatpush.msra.mxu0 %v701_v58  ;;  %v1045_v56 = vld [vmem:[#allocation7 + $0x4d8] sm:$0xff] }
  0xe8   : > { %778 = vmatpush.msrb.mxu3 %v681_v4  ;;  %v913_v4 = vld [vmem:[#allocation7 + $0x3d0] sm:$0xff] }
  0xe9   : > { %v569_v16 = vrot.slane %v517_v15, 7  ;;  %798 = vmatpush.msra.mxu0 %v700_v60  ;;  %v915_v60 = vld [vmem:[#allocation7 + $0x3e0] sm:$0xff] }
  0xea   : > { %962 = vmatpush.msra.mxu3 %v902_v47  ;;  %988 = vmatpush.msra.mxu1 %v915_v60  ;;  %v1044_v60 = vld [vmem:[#allocation7 + $0x4d0] sm:$0xff] }
  0xeb   : > { %v570_v18 = vsel %vm419_vm0, %v568_v9, %v569_v16  ;;  %v575_v25 = vsel %vm419_vm0, %v569_v16, 0.0  ;;  %799 = vmatpush.msra.mxu0 %v699_v62  ;;  %v897_v62 = vld [vmem:[#allocation7 + $0x350] sm:$0xff] }
  0xec   : > { %v579_v19 = vrot.slane %v570_v18, 1  ;;  %v586_v20 = vrot.slane %v570_v18, 2  ;;  %612 = vmatmul.f32.gmra.mxu3 %v570_v18  ;;  %v581_v26 = vrot.slane %v575_v25, 1  ;;  %v588_v27 = vrot.slane %v575_v25, 2  ;;  %989 = vmatpush.msra.mxu1 %v914_v63 }
  0xed   : > { %800 = vmatpush.msra.mxu0 %v698_v0  ;;  %963 = vmatpush.msra.mxu3 %v901_v48  ;;  %v930_v0 = vld [vmem:[#allocation7 + $0x458] sm:$0xff] }
  0xee   : > { %v580_v23 = vsel %vm430_vm2, %v578_v21, %v579_v19  ;;  %v587_v24 = vsel %vm438_vm1, %v585_v22, %v586_v20  ;;  %v582_v28 = vsel %vm430_vm2, %v579_v19, %v581_v26  ;;  %v589_v29 = vsel %vm438_vm1, %v586_v20, %v588_v27  ;;  %990 = vmatpush.msra.mxu1 %v913_v4 }
  0xef   : > { %632 = vmatmul.f32.vlgmr.msrb.gmra.mxu0 %v580_v23  ;;  %655 = vmatmul.f32.vlgmr.msrb.gmra.mxu1 %v587_v24 }
  0xf0   : > { %801 = vmatpush.msra.mxu0 %v697_v5  ;;  %964 = vmatpush.msra.mxu3 %v900_v49  ;;  %v929_v5 = vld [vmem:[#allocation7 + $0x450] sm:$0xff]  ;;  %v1047_v49 = vld [vmem:[#allocation7 + $0x4e8] sm:$0xff] }
  0xf2   : > { %965 = vmatpush.msra.mxu3 %v899_v55 }
  0xf4   : > { %966 = vmatpush.msra.mxu3 %v898_v59 }
  0xf6   : > { %967 = vmatpush.msra.mxu3 %v897_v62 }
  0xf7   : > { %635 = vmatmul.f32.gmra.mxu0 %v582_v28  ;;  %658 = vmatmul.f32.gmra.mxu1 %v589_v29 }
  0xf8   : > { %968 = vmatpush.msra.mxu3 %v896_v3 }
 0x166   : > { %v610_v6 = vpop.f32.mrf.mxu3 }
 0x167   : > { %v611_v8 = vadd.f32 %v610_v6, %v592_v7  ;;  %v895_v6 = vld [vmem:[#allocation7 + $0x340] sm:$0xff] }
 0x168   : > { %969 = vmatpush.msra.mxu3 %v895_v6 }
 0x16c   : > { %v633_v9 = vpop.f32.mrf.mxu0  ;;  %v656_v10 = vpop.f32.mrf.mxu1 }
 0x16d   : > { %v634_v11 = vadd.f32 %v633_v9, %v611_v8  ;;  %v893_v9 = vld [vmem:[#allocation7 + $0x330] sm:$0xff] }
 0x16f   : > { %v657_v12 = vadd.f32 %v656_v10, %v634_v11  ;;  %v613_v13 = vpop.f32.mrf.mxu3  ;;  %v892_v10 = vld [vmem:[#allocation7 + $0x328] sm:$0xff]  ;;  %v891_v11 = vld [vmem:[#allocation7 + $0x320] sm:$0xff] }
 0x170   : > { %v614_v17 = vadd.f32 %v613_v13, %v592_v7  ;;  %v894_v7 = vld [vmem:[#allocation7 + $0x338] sm:$0xff] }
 0x171   : > { %v662_v15 = vmax.f32 %v657_v12, 0.0  ;;  %970 = vmatpush.msra.mxu3 %v894_v7 }
 0x173   : > { %v715_v16 = vrot.slane %v662_v15, 7  ;;  %971 = vmatpush.msra.mxu3 %v893_v9  ;;  %v890_v15 = vld [vmem:[#allocation7 + $0x318] sm:$0xff] }
 0x174   : > { %v636_v18 = vpop.f32.mrf.mxu0  ;;  %v659_v20 = vpop.f32.mrf.mxu1 }
 0x175   : > { %v637_v19 = vadd.f32 %v636_v18, %v614_v17  ;;  %1333 = vmatmul.msk.f32.vlgmr.msrb.gmra.mxu2 %vm1831_vm3, %v715_v16  ;;  %v721_v23 = vsel %vm419_vm0, 0.0, %v715_v16  ;;  %972 = vmatpush.msra.mxu3 %v892_v10  ;;  %v928_v17 = vld [vmem:[#allocation7 + $0x448] sm:$0xff]  ;;  %v889_v18 = vld [vmem:[#allocation7 + $0x310] sm:$0xff] }
 0x176   : > { %v732_v26 = vrot.slane %v721_v23, 2  ;;  %v725_v29 = vrot.slane %v721_v23, 1  ;;  %867 = vmatpush.msrb.mxu2 %v851_v39  ;;  %v926_v23 = vld [vmem:[#allocation7 + $0x438] sm:$0xff]  ;;  %v739_v39 = vperm.slane %v1846_v50, 2 }
 0x177   : > { %v660_v21 = vadd.f32 %v659_v20, %v637_v19  ;;  %973 = vmatpush.msra.mxu3 %v891_v11  ;;  %v911_v19 = vld [vmem:[#allocation7 + $0x3c0] sm:$0xff] }
 0x178   : > { %868 = vmatpush.msrb.mxu2 %v850_v40  ;;  %v927_v20 = vld [vmem:[#allocation7 + $0x440] sm:$0xff] }
 0x179   : > { %v663_v22 = vmax.f32 %v660_v21, 0.0  ;;  %974 = vmatpush.msra.mxu3 %v890_v15  ;;  %v888_v21 = vld [vmem:[#allocation7 + $0x308] sm:$0xff] }
 0x17a   : > { %869 = vmatpush.msrb.mxu2 %v849_v41 }
 0x17b   : > { %v716_v24 = vrot.slane %v663_v22, 7  ;;  %975 = vmatpush.msra.mxu3 %v889_v18  ;;  %v910_v22 = vld [vmem:[#allocation7 + $0x3b8] sm:$0xff] }
 0x17c   : > { %870 = vmatpush.msrb.mxu2 %v848_v42  ;;  %v1065_v18 = vld [vmem:[#allocation7 + $0x578] sm:$0xff] }
 0x17d   : > { %v717_v25 = vsel %vm419_vm0, %v715_v16, %v716_v24  ;;  %v722_v32 = vsel %vm419_vm0, %v716_v24, 0.0  ;;  %v912_v16 = vld [vmem:[#allocation7 + $0x3c8] sm:$0xff]  ;;  %976 = vmatpush.msra.mxu3 %v888_v21  ;;  %v887_v24 = vld [vmem:[#allocation7 + $0x300] sm:$0xff]  ;;  %v1064_v21 = vld [vmem:[#allocation7 + $0x570] sm:$0xff] }
 0x17e   : > { %v726_v27 = vrot.slane %v717_v25, 1  ;;  %v733_v28 = vrot.slane %v717_v25, 2  ;;  %759 = vmatmul.f32.gmra.mxu2 %v717_v25  ;;  %v728_v34 = vrot.slane %v722_v32, 1  ;;  %v735_v35 = vrot.slane %v722_v32, 2  ;;  %991 = vmatpush.msra.mxu1 %v912_v16  ;;  %v909_v25 = vld [vmem:[#allocation7 + $0x3b0] sm:$0xff]  ;;  %v922_v32 = vld [vmem:[#allocation7 + $0x418] sm:$0xff] }
 0x17f   : > { %871 = vmatpush.msrb.mxu2 %v847_v43  ;;  %977 = vmatpush.msra.mxu3 %v887_v24  ;;  %v1063_v24 = vld [vmem:[#allocation7 + $0x568] sm:$0xff] }
 0x180   : > { %v727_v30 = vsel %vm430_vm2, %v725_v29, %v726_v27  ;;  %v734_v31 = vsel %vm438_vm1, %v732_v26, %v733_v28  ;;  %v729_v36 = vsel %vm430_vm2, %v726_v27, %v728_v34  ;;  %v736_v37 = vsel %vm438_vm1, %v733_v28, %v735_v35  ;;  %992 = vmatpush.msra.mxu1 %v911_v19  ;;  %v925_v26 = vld [vmem:[#allocation7 + $0x430] sm:$0xff]  ;;  %v908_v27 = vld [vmem:[#allocation7 + $0x3a8] sm:$0xff]  ;;  %v907_v29 = vld [vmem:[#allocation7 + $0x3a0] sm:$0xff] }
 0x181   : > { %779 = vmatmul.f32.vlgmr.msrb.gmra.mxu3 %v727_v30  ;;  %802 = vmatmul.f32.vlgmr.msra.gmra.mxu0 %v734_v31  ;;  %v924_v28 = vld [vmem:[#allocation7 + $0x428] sm:$0xff]  ;;  %v923_v30 = vld [vmem:[#allocation7 + $0x420] sm:$0xff]  ;;  %v906_v31 = vld [vmem:[#allocation7 + $0x398] sm:$0xff] }
 0x182   : > { %872 = vmatpush.msrb.mxu2 %v846_v44  ;;  %993 = vmatpush.msra.mxu1 %v910_v22  ;;  %v921_v34 = vld [vmem:[#allocation7 + $0x410] sm:$0xff]  ;;  %v904_v35 = vld [vmem:[#allocation7 + $0x388] sm:$0xff]  ;;  %v1081_v19 = vld [vmem:[#allocation7 + $0x5f8] sm:$0xff] }
 0x183   : > { %1132 = vmatpush.msrb.mxu3 %v1065_v18  ;;  %v1080_v22 = vld [vmem:[#allocation7 + $0x5f0] sm:$0xff] }
 0x184   : > { %873 = vmatpush.msrb.mxu2 %v845_v45  ;;  %994 = vmatpush.msra.mxu1 %v909_v25  ;;  %v1049_v45 = vld [vmem:[#allocation7 + $0x4f8] sm:$0xff]  ;;  %v1079_v25 = vld [vmem:[#allocation7 + $0x5e8] sm:$0xff] }
 0x185   : > { %1109 = vmatpush.msrb.mxu0 %v1049_v45  ;;  %1133 = vmatpush.msrb.mxu3 %v1064_v21  ;;  %v1056_v45 = vld [vmem:[#allocation7 + $0x530] sm:$0xff] }
 0x186   : > { %1334 = vmatmul.msk.f32.vlgmr.msra.gmra.mxu2 %vm814_vm4, %v812_v33  ;;  %995 = vmatpush.msra.mxu1 %v908_v27  ;;  %v905_v33 = vld [vmem:[#allocation7 + $0x390] sm:$0xff]  ;;  %v1062_v27 = vld [vmem:[#allocation7 + $0x560] sm:$0xff] }
 0x187   : > { %874 = vmatpush.msrb.mxu2 %v844_v46  ;;  %v1048_v46 = vld [vmem:[#allocation7 + $0x4f0] sm:$0xff]  ;;  %1134 = vmatpush.msrb.mxu3 %v1063_v24 }
 0x188   : > { %996 = vmatpush.msra.mxu1 %v907_v29  ;;  %1110 = vmatpush.msrb.mxu0 %v1048_v46  ;;  %v1039_v29 = vld [vmem:[#allocation7 + $0x4a8] sm:$0xff]  ;;  %v1072_v46 = vld [vmem:[#allocation7 + $0x5b0] sm:$0xff] }
 0x189   : > { %782 = vmatmul.f32.gmra.mxu3 %v729_v36  ;;  %805 = vmatmul.f32.gmra.mxu0 %v736_v37  ;;  %v920_v36 = vld [vmem:[#allocation7 + $0x408] sm:$0xff]  ;;  %v903_v37 = vld [vmem:[#allocation7 + $0x380] sm:$0xff] }
 0x18a   : > { %1008 = vmatpush.msra.mxu2 %v934_v52  ;;  %997 = vmatpush.msra.mxu1 %v906_v31  ;;  %v1077_v31 = vld [vmem:[#allocation7 + $0x5d8] sm:$0xff] }
 0x18b   : > { %1111 = vmatpush.msrb.mxu0 %v1047_v49  ;;  %1135 = vmatpush.msrb.mxu3 %v1062_v27  ;;  %v1054_v49 = vld [vmem:[#allocation7 + $0x520] sm:$0xff] }
 0x18c   : > { %1009 = vmatpush.msra.mxu2 %v933_v54  ;;  %998 = vmatpush.msra.mxu1 %v905_v33  ;;  %v1060_v33 = vld [vmem:[#allocation7 + $0x550] sm:$0xff] }
 0x18d   : > { %1112 = vmatpush.msrb.mxu0 %v1046_v53  ;;  %v1069_v53 = vld [vmem:[#allocation7 + $0x598] sm:$0xff] }
 0x18e   : > { %1335 = vmatmul.msk.f32.gmra.mxu2 %vm814_vm4, %v813_v38  ;;  %999 = vmatpush.msra.mxu1 %v904_v35  ;;  %v919_v38 = vld [vmem:[#allocation7 + $0x400] sm:$0xff]  ;;  %v1037_v35 = vld [vmem:[#allocation7 + $0x498] sm:$0xff] }
 0x18f   : > { %1010 = vmatpush.msra.mxu2 %v932_v57  ;;  %1113 = vmatpush.msrb.mxu0 %v1045_v56  ;;  %v1068_v56 = vld [vmem:[#allocation7 + $0x590] sm:$0xff] }
 0x190   : > { %1000 = vmatpush.msra.mxu1 %v903_v37  ;;  %v1075_v37 = vld [vmem:[#allocation7 + $0x5c8] sm:$0xff] }
 0x191   : > { %1011 = vmatpush.msra.mxu2 %v931_v61  ;;  %1114 = vmatpush.msrb.mxu0 %v1044_v60  ;;  %v1066_v60 = vld [vmem:[#allocation7 + $0x580] sm:$0xff] }
 0x192   : > { %1155 = vmatpush.msrb.mxu1 %v1081_v19 }
 0x193   : > { %1012 = vmatpush.msra.mxu2 %v930_v0 }
 0x194   : > { %1156 = vmatpush.msrb.mxu1 %v1080_v22 }
 0x195   : > { %1013 = vmatpush.msra.mxu2 %v929_v5 }
 0x196   : > { %1157 = vmatpush.msrb.mxu1 %v1079_v25 }
 0x197   : > { %1014 = vmatpush.msra.mxu2 %v928_v17  ;;  %v1043_v17 = vld [vmem:[#allocation7 + $0x4c8] sm:$0xff] }
 0x198   : > { %1115 = vmatpush.msrb.mxu0 %v1043_v17 }
 0x199   : > { %1015 = vmatpush.msra.mxu2 %v927_v20  ;;  %v1042_v20 = vld [vmem:[#allocation7 + $0x4c0] sm:$0xff] }
 0x19a   : > { %1116 = vmatpush.msrb.mxu0 %v1042_v20 }
 0x19b   : > { %1016 = vmatpush.msra.mxu2 %v926_v23  ;;  %v1041_v23 = vld [vmem:[#allocation7 + $0x4b8] sm:$0xff] }
 0x19c   : > { %1117 = vmatpush.msrb.mxu0 %v1041_v23 }
 0x19d   : > { %1017 = vmatpush.msra.mxu2 %v925_v26  ;;  %v1040_v26 = vld [vmem:[#allocation7 + $0x4b0] sm:$0xff] }
 0x19e   : > { %1118 = vmatpush.msrb.mxu0 %v1040_v26 }
 0x19f   : > { %1018 = vmatpush.msra.mxu2 %v924_v28  ;;  %v1078_v28 = vld [vmem:[#allocation7 + $0x5e0] sm:$0xff] }
 0x1a0   : > { %1158 = vmatpush.msrb.mxu1 %v1078_v28  ;;  %1119 = vmatpush.msrb.mxu0 %v1039_v29  ;;  %v1108_v29 = vperm.slane %v1846_v50, 4 }
 0x1a1   : > { %1019 = vmatpush.msra.mxu2 %v923_v30  ;;  %v1061_v30 = vld [vmem:[#allocation7 + $0x558] sm:$0xff] }
 0x1a2   : > { %1136 = vmatpush.msrb.mxu3 %v1061_v30  ;;  %1159 = vmatpush.msrb.mxu1 %v1077_v31 }
 0x1a3   : > { %1020 = vmatpush.msra.mxu2 %v922_v32  ;;  %v1038_v32 = vld [vmem:[#allocation7 + $0x4a0] sm:$0xff] }
 0x1a4   : > { %1120 = vmatpush.msrb.mxu0 %v1038_v32  ;;  %1137 = vmatpush.msrb.mxu3 %v1060_v33 }
 0x1a5   : > { %1021 = vmatpush.msra.mxu2 %v921_v34  ;;  %v1076_v34 = vld [vmem:[#allocation7 + $0x5d0] sm:$0xff] }
 0x1a6   : > { %1160 = vmatpush.msrb.mxu1 %v1076_v34  ;;  %1121 = vmatpush.msrb.mxu0 %v1037_v35 }
 0x1a7   : > { %1022 = vmatpush.msra.mxu2 %v920_v36  ;;  %v1059_v36 = vld [vmem:[#allocation7 + $0x548] sm:$0xff] }
 0x1a8   : > { %1138 = vmatpush.msrb.mxu3 %v1059_v36  ;;  %1161 = vmatpush.msrb.mxu1 %v1075_v37 }
 0x1a9   : > { %1023 = vmatpush.msra.mxu2 %v919_v38  ;;  %v1036_v38 = vld [vmem:[#allocation7 + $0x490] sm:$0xff] }
 0x1aa   : > { %1122 = vmatpush.msrb.mxu0 %v1036_v38 }
 0x1f8   : > { %v1885_v58 = vpop.f32.mrf.mxu2 }
 0x1f9   : > { %v758_v41 = vadd.f32 %v1885_v58, %v739_v39 }
 0x1fe   : > { %v803_v43 = vpop.f32.mrf.mxu0 }
 0x201   : > { %v1887_v8 = vpop.f32.mrf.mxu2 }
 0x202   : > { %v761_v48 = vadd.f32 %v1887_v8, %v739_v39  ;;  %v1058_v39 = vld [vmem:[#allocation7 + $0x540] sm:$0xff] }
 0x203   : > { %1139 = vmatpush.msrb.mxu3 %v1058_v39 }
 0x204   : > { %v780_v40 = vpop.f32.mrf.mxu3 }
 0x205   : > { %v781_v42 = vadd.f32 %v780_v40, %v758_v41  ;;  %v1074_v40 = vld [vmem:[#allocation7 + $0x5c0] sm:$0xff]  ;;  %v1035_v41 = vld [vmem:[#allocation7 + $0x488] sm:$0xff] }
 0x206   : > { %v806_v57 = vpop.f32.mrf.mxu0  ;;  %1162 = vmatpush.msrb.mxu1 %v1074_v40  ;;  %1123 = vmatpush.msrb.mxu0 %v1035_v41 }
 0x207   : > { %v804_v44 = vadd.f32 %v803_v43, %v781_v42  ;;  %v1057_v42 = vld [vmem:[#allocation7 + $0x538] sm:$0xff] }
 0x208   : > { %v1073_v43 = vld [vmem:[#allocation7 + $0x5b8] sm:$0xff]  ;;  %1140 = vmatpush.msrb.mxu3 %v1057_v42 }
 0x209   : > { %v838_v12 = vpop.f32.mrf.mxu2  ;;  %v809_v52 = vadd.f32 %v804_v44, %v1849_v2  ;;  %1163 = vmatpush.msrb.mxu1 %v1073_v43  ;;  %v1034_v44 = vld [vmem:[#allocation7 + $0x480] sm:$0xff] }
 0x20a   : > { %1336 = vmatmul.msk.f32.vlgmr.msrb.gmra.mxu2 %vm852_vm5, %v838_v12  ;;  %1124 = vmatpush.msrb.mxu0 %v1034_v44 }
 0x20b   : > { %1141 = vmatpush.msrb.mxu3 %v1056_v45  ;;  %1164 = vmatpush.msrb.mxu1 %v1072_v46 }
 0x20c   : > { %v783_v47 = vpop.f32.mrf.mxu3 }
 0x20d   : > { %v784_v51 = vadd.f32 %v783_v47, %v761_v48  ;;  %v1055_v47 = vld [vmem:[#allocation7 + $0x528] sm:$0xff] }
 0x20e   : > { %v1071_v48 = vld [vmem:[#allocation7 + $0x5a8] sm:$0xff]  ;;  %1142 = vmatpush.msrb.mxu3 %v1055_v47 }
 0x20f   : > { %v807_v58 = vadd.f32 %v806_v57, %v784_v51  ;;  %1165 = vmatpush.msrb.mxu1 %v1071_v48  ;;  %v1070_v51 = vld [vmem:[#allocation7 + $0x5a0] sm:$0xff]  ;;  %v1051_v57 = vld [vmem:[#allocation7 + $0x508] sm:$0xff] }
 0x210   : > { %1143 = vmatpush.msrb.mxu3 %v1054_v49 }
 0x211   : > { %v841_v13 = vpop.f32.mrf.mxu2  ;;  %v810_v2 = vadd.f32 %v807_v58, %v1854_v14  ;;  %1166 = vmatpush.msrb.mxu1 %v1070_v51  ;;  %v1067_v58 = vld [vmem:[#allocation7 + $0x588] sm:$0xff] }
 0x212   : > { %1337 = vmatmul.msk.f32.gmra.mxu2 %vm852_vm5, %v841_v13 }
 0x213   : > { %1167 = vmatpush.msrb.mxu1 %v1069_v53 }
 0x215   : > { %1168 = vmatpush.msrb.mxu1 %v1068_v56 }
 0x217   : > { %1169 = vmatpush.msrb.mxu1 %v1067_v58 }
 0x219   : > { %1170 = vmatpush.msrb.mxu1 %v1066_v60 }
 0x28d   : > { %v876_v54 = vpop.f32.mrf.mxu2 }
 0x28e   : > { %v1893_v55 = vadd.f32 %v876_v54, %v809_v52  ;;  %v1053_v52 = vld [vmem:[#allocation7 + $0x518] sm:$0xff]  ;;  %v1052_v54 = vld [vmem:[#allocation7 + $0x510] sm:$0xff] }
 0x28f   : > { %1144 = vmatpush.msrb.mxu3 %v1053_v52 }
 0x290   : > { %v884_v59 = vmax.f32 %v1893_v55, 0.0 }
 0x291   : > { %1145 = vmatpush.msrb.mxu3 %v1052_v54 }
 0x292   : > { %v937_v61 = vrot.slane %v884_v59, 7  ;;  %v1050_v59 = vld [vmem:[#allocation7 + $0x500] sm:$0xff] }
 0x293   : > { %1146 = vmatpush.msrb.mxu3 %v1051_v57 }
 0x294   : > { %1339 = vmatmul.msk.f32.vlgmr.msra.gmra.mxu3 %vm1831_vm3, %v937_v61  ;;  %v943_v3 = vsel %vm419_vm0, 0.0, %v937_v61 }
 0x295   : > { %v879_v62 = vpop.f32.mrf.mxu2  ;;  %v947_v8 = vrot.slane %v943_v3, 1  ;;  %v954_v9 = vrot.slane %v943_v3, 2  ;;  %1147 = vmatpush.msrb.mxu3 %v1050_v59 }
 0x296   : > { %v1899_v63 = vadd.f32 %v879_v62, %v810_v2  ;;  %v961_v2 = vperm.slane %v1846_v50, 3 }
 0x298   : > { %v885_v0 = vmax.f32 %v1899_v63, 0.0 }
 0x29a   : > { %v938_v4 = vrot.slane %v885_v0, 7 }
 0x29c   : > { %v939_v5 = vsel %vm419_vm0, %v937_v61, %v938_v4  ;;  %v944_v14 = vsel %vm419_vm0, %v938_v4, 0.0 }
 0x29d   : > { %v948_v6 = vrot.slane %v939_v5, 1  ;;  %v955_v7 = vrot.slane %v939_v5, 2  ;;  %981 = vmatmul.f32.gmra.mxu3 %v939_v5  ;;  %v950_v12 = vrot.slane %v944_v14, 1  ;;  %v957_v13 = vrot.slane %v944_v14, 2 }
 0x29f   : > { %v949_v10 = vsel %vm430_vm2, %v947_v8, %v948_v6  ;;  %v956_v11 = vsel %vm438_vm1, %v954_v9, %v955_v7  ;;  %v951_v15 = vsel %vm430_vm2, %v948_v6, %v950_v12  ;;  %v958_v16 = vsel %vm438_vm1, %v955_v7, %v957_v13 }
 0x2a0   : > { %1001 = vmatmul.f32.vlgmr.msra.gmra.mxu1 %v949_v10  ;;  %1024 = vmatmul.f32.vlgmr.msra.gmra.mxu2 %v956_v11 }
 0x2a8   : > { %1004 = vmatmul.f32.gmra.mxu1 %v951_v15  ;;  %1027 = vmatmul.f32.gmra.mxu2 %v958_v16 }
 0x317   : > { %v979_v61 = vpop.f32.mrf.mxu3 }
 0x318   : > { %v980_v0 = vadd.f32 %v979_v61, %v961_v2 }
 0x31d   : > { %v1002_v62 = vpop.f32.mrf.mxu1 }
 0x31e   : > { %v1003_v3 = vadd.f32 %v1002_v62, %v980_v0 }
 0x320   : > { %v982_v6 = vpop.f32.mrf.mxu3 }
 0x321   : > { %v983_v9 = vadd.f32 %v982_v6, %v961_v2 }
 0x323   : > { %v1025_v4 = vpop.f32.mrf.mxu2 }
 0x324   : > { %v1026_v5 = vadd.f32 %v1025_v4, %v1003_v3 }
 0x325   : > { %v1005_v8 = vpop.f32.mrf.mxu1 }
 0x326   : > { %v1031_v7 = vmax.f32 %v1026_v5, 0.0  ;;  %v1006_v11 = vadd.f32 %v1005_v8, %v983_v9 }
 0x328   : > { %v1084_v10 = vrot.slane %v1031_v7, 7 }
 0x32a   : > { %1341 = vmatmul.msk.f32.vlgmr.msrb.gmra.mxu0 %vm1831_vm3, %v1084_v10  ;;  %v1090_v15 = vsel %vm419_vm0, 0.0, %v1084_v10 }
 0x32b   : > { %v1028_v14 = vpop.f32.mrf.mxu2  ;;  %v1094_v18 = vrot.slane %v1090_v15, 1  ;;  %v1101_v19 = vrot.slane %v1090_v15, 2 }
 0x32c   : > { %v1029_v12 = vadd.f32 %v1028_v14, %v1006_v11 }
 0x32e   : > { %v1032_v13 = vmax.f32 %v1029_v12, 0.0 }
 0x330   : > { %v1085_v16 = vrot.slane %v1032_v13, 7 }
 0x332   : > { %v1086_v17 = vsel %vm419_vm0, %v1084_v10, %v1085_v16  ;;  %v1091_v1 = vsel %vm419_vm0, %v1085_v16, 0.0 }
 0x333   : > { %v1095_v20 = vrot.slane %v1086_v17, 1  ;;  %v1102_v21 = vrot.slane %v1086_v17, 2  ;;  %1128 = vmatmul.f32.gmra.mxu0 %v1086_v17  ;;  %v1097_v24 = vrot.slane %v1091_v1, 1  ;;  %v1104_v25 = vrot.slane %v1091_v1, 2 }
 0x335   : > { %v1096_v22 = vsel %vm430_vm2, %v1094_v18, %v1095_v20  ;;  %v1103_v23 = vsel %vm438_vm1, %v1101_v19, %v1102_v21  ;;  %v1098_v26 = vsel %vm430_vm2, %v1095_v20, %v1097_v24  ;;  %v1105_v27 = vsel %vm438_vm1, %v1102_v21, %v1104_v25 }
 0x336   : > { %1148 = vmatmul.f32.vlgmr.msrb.gmra.mxu3 %v1096_v22  ;;  %1171 = vmatmul.f32.vlgmr.msrb.gmra.mxu1 %v1103_v23 }
 0x33e   : > { %1151 = vmatmul.f32.gmra.mxu3 %v1098_v26  ;;  %1174 = vmatmul.f32.gmra.mxu1 %v1105_v27 }
 0x3a7   : > { %v1126_v28 = vpop.f32.mrf.mxu0 }
 0x3a8   : > { %v1127_v30 = vadd.f32 %v1126_v28, %v1108_v29 }
 0x3b0   : > { %v1129_v35 = vpop.f32.mrf.mxu0 }
 0x3b1   : > { %v1130_v37 = vadd.f32 %v1129_v35, %v1108_v29 }
 0x3b3   : > { %v1172_v31 = vpop.f32.mrf.mxu1 }
 0x3b9   : > { %v1149_v32 = vpop.f32.mrf.mxu3 }
 0x3ba   : > { %v1150_v33 = vadd.f32 %v1149_v32, %v1127_v30 }
 0x3bb   : > { %v1175_v39 = vpop.f32.mrf.mxu1 }
 0x3bc   : > { %v1173_v34 = vadd.f32 %v1172_v31, %v1150_v33 }
 0x3be   : > { %v1178_v36 = vadd.f32 %v1173_v34, %v1893_v55 }
 0x3c0   : > { %1180 = vst [vmem:[%s361_s19] sm:$0xff] %v1178_v36 }
 0x3c1   : > { %v1152_v50 = vpop.f32.mrf.mxu3 }
 0x3c2   : > { %v1153_v38 = vadd.f32 %v1152_v50, %v1130_v37 }
 0x3c4   : > { %v1176_v40 = vadd.f32 %v1175_v39, %v1153_v38 }
 0x3c6   : > { %v1179_v41 = vadd.f32 %v1176_v40, %v1899_v63 }
 0x3c8   : > { %1181 = vst [vmem:[%s361_s19 + $0x8] sm:$0xff] %v1179_v41 }
 0x3c9   : > { %1577 = shalt.err (!%p1574_p12)
}
 0x3ca   : > { %s1631_s15 = smov 128   ;;  %s1632_s20 = smov 8  }
 0x3cb   : > { %1363 = dma.vmem_to_hbm [thread:$0]  (%p1764_p3), %s1196_s10, 256, %s1198_s14, %s1183_s28, %s1631_s15, %s1631_s15, %s1632_s20  }
 0x3cc PF: > { %s1212_s23 = sand.u32 1, %s1612_s24   ;;  %p1979_p13 = scmp.ge.s32.totalorder %s1624_s27, 2 }
 0x3cd   : > { %s1213_s30 = scalar_lea.sflag [#allocation4], %s1212_s23 }
 0x3ce   : > { %p1380_p0 = pnand %p1979_p13, %p1708_p6 }
 0x3d0   : > { %p1381_p5 = pneg %p1380_p0 }
 0x3d2   : > { %1607 = dma.done.wait (%p1381_p5), %s1213_s30, 256  }
 0x3d3   : > { %1609 = vsyncadd (%p1381_p5), %s1213_s30, 4294967040  ;;  %p22_p7 = scmp.ge.s32.totalorder %s1746_s13, 4   ;;  %s1980_s24 = smov %s1616_s25 }
 0x3d4   : > { %s1981_s25 = smov %s1620_s26  ;;  %s1982_s26 = smov %s1760_s17 }
 0x3d5   : > { %s1983_s27 = smov %s1746_s13  ;;  %24 = sbr.rel (!%p22_p7) target bundleno = 9 (0x9), region = 111 }
 0x3da   :  { %1219 = vsyncpa [#allocation3], 1 }
 0x3db   :  { %1221 = vsyncpa [#allocation3 + $0x1], 1 }
 0x3dc   :  { %1222 = vsyncpa [#allocation6], 1 }
 0x3dd   :  { %1223 = vsyncpa [#allocation9], 1 }
 0x3de   :  { %1224 = vsyncpa [#allocation4], 1 }
 0x3df   :  { %1226 = vsyncpa [#allocation4 + $0x1], 1 }

</bundles_post_ra>
